<compile_context>
chip_gen: v6e
topology: v6e:2x2x1
jax: 0.10.0
libtpu: 0.0.40
codegen_flags: <defaults>
</compile_context>

<pallas_src>
import math

import numpy as np
import jax
import jax.numpy as jnp
from jax import lax
from jax.experimental import pallas as pl
from jax.experimental.pallas import tpu as pltpu

LEAKY_SLOPE = 0.2
GN_EPS = 1e-6
INV_SQRT2 = 1.0 / math.sqrt(2.0)

# MXU matmul operand dtype (accumulation is always f32).  bf16 is the fast path on
# v6e/v7x and is fine as an MXU input on v5e; set to jnp.float32 for bit-tighter matmuls.
MXU_DTYPE = jnp.bfloat16


def _round_up(v, m):
    return ((v + m - 1) // m) * m


# ----------------------------------------------------------------------------- kernel

def _make_resblock_kernel(H, W, Cin, Cout, G1, G2, KP1, KP2, PAD):
    """Builds the fused ResidualBlock kernel for a fixed static configuration."""
    HW = H * W

    def kernel(x_ref, mask_ref, pvec_ref, w1_ref, w2_ref, wskip_ref,
               o_ref,
               act_ref, tap_ref):
        # x_ref:     (1, Cin, HW) f32   one image, channels on sublanes, pixels on lanes
        # mask_ref:  (9, 1, HW)   f32   per-tap source-pixel validity (0/1)
        # pvec_ref:  (CP, 8)      f32   packed per-channel params
        #                               cols: gamma1, beta1, gamma2, beta2, b1, b2, 0, 0
        # w1_ref:    (Cout, 9*KP1) MXU_DTYPE   packed 3x3 conv1 weights (K padded per tap)
        # w2_ref:    (Cout, 9*KP2) MXU_DTYPE   packed 3x3 conv2 weights
        # wskip_ref: (Cout, Cin)   MXU_DTYPE
        # o_ref:     (1, Cout, HW) f32
        # act_ref:   (CACT, HW+2*PAD) f32       lane-padded activation scratch
        #                                        (pads never zeroed: content is don't-care)
        # tap_ref:   (9*max(KP1,KP2), HW) MXU_DTYPE   packed im2col taps

        def gn_act(h, gamma, beta, G):
            """One-pass GroupNorm + fused affine + LeakyReLU.  h: (C, HW) f32."""
            C = h.shape[0]
            cpg = C // G
            inv_n = 1.0 / float(cpg * HW)
            # Per-channel first/second moments in one sweep over h (lane reduces).
            csum = jnp.sum(h, axis=1, keepdims=True)                    # (C, 1)
            csq = jnp.sum(h * h, axis=1, keepdims=True)                 # (C, 1)
            # Contiguous-group reduce/broadcast on tiny (C,1) vectors (no mask inputs).
            ch = lax.broadcasted_iota(jnp.int32, (C, 1), 0)
            mean = jnp.zeros((C, 1), jnp.float32)
            ex2 = jnp.zeros((C, 1), jnp.float32)
            for g in range(G):                                          # G is tiny & static
                m = ((ch >= g * cpg) & (ch < (g + 1) * cpg)).astype(jnp.float32)
                mean = mean + m * (jnp.sum(m * csum, axis=0, keepdims=True) * inv_n)
                ex2 = ex2 + m * (jnp.sum(m * csq, axis=0, keepdims=True) * inv_n)
            var = ex2 - mean * mean
            scale = gamma * lax.rsqrt(var + GN_EPS)                     # (C, 1)
            shift = beta - mean * scale
            y = h * scale + shift                                       # single FMA pass
            return jnp.where(y >= 0.0, y, LEAKY_SLOPE * y)              # LeakyReLU(0.2)

        def conv3x3(h, w_ref, bias, KP):
            """3x3 / pad=1 conv as one (Cout, 9*KP) x (9*KP, HW) MXU matmul."""
            C = h.shape[0]
            # Centre store is lane-aligned (PAD % 128 == 0); pad columns are never
            # initialised -- each non-centre tap is validity-masked with a select below,
            # so garbage (even NaN) in the pads cannot reach the matmul.
            act_ref[0:C, PAD:PAD + HW] = h
            for t in range(9):                                          # static unroll
                oy, ox = t // 3 - 1, t % 3 - 1
                start = PAD + oy * W + ox
                win = act_ref[0:C, start:start + HW]                    # shifted tap plane
                if (oy, ox) != (0, 0):
                    # select (not multiply): zeros out-of-image source pixels and kills
                    # any non-finite garbage read from the uninitialised pad columns.
                    win = jnp.where(mask_ref[t] != 0.0, win, 0.0)
                tap_ref[t * KP:t * KP + C, :] = win.astype(tap_ref.dtype)
                if C < KP:
                    # Padded K rows must be finite (their packed-weight rows are zero);
                    # write them per conv -- free when C is 16-aligned, megacore-safe.
                    tap_ref[t * KP + C:(t + 1) * KP, :] = jnp.zeros(
                        (KP - C, HW), tap_ref.dtype)
            out = jnp.dot(w_ref[...], tap_ref[0:9 * KP, :],
                          preferred_element_type=jnp.float32)           # (Cout, HW)
            return out + bias

        x = x_ref[0]                                                    # (Cin, HW) f32
        x_mxu = x.astype(MXU_DTYPE)                                     # only copy kept alive
                                                                        # for the skip matmul
        gamma1 = pvec_ref[0:Cin, 0:1]
        beta1 = pvec_ref[0:Cin, 1:2]
        gamma2 = pvec_ref[0:Cout, 2:3]
        beta2 = pvec_ref[0:Cout, 3:4]
        b1 = pvec_ref[0:Cout, 4:5]
        b2 = pvec_ref[0:Cout, 5:6]

        h = gn_act(x, gamma1, beta1, G1)                                # GN1 + act
        h = conv3x3(h, w1_ref, b1, KP1)                                 # conv1
        h = gn_act(h, gamma2, beta2, G2)                                # GN2 + act
        h = conv3x3(h, w2_ref, b2, KP2)                                 # conv2

        skip = jnp.dot(wskip_ref[...], x_mxu,                           # 1x1 channel-mix skip
                       preferred_element_type=jnp.float32)              # (Cout, HW)
        o_ref[0] = ((h + skip) * INV_SQRT2).astype(o_ref.dtype)         # residual + rescale

    return kernel


# ----------------------------------------------------------------------------- wrapper

def _pack_conv_weight(w_hwio, kp):
    """(3,3,Cin,Cout) HWIO -> (Cout, 9*kp) with the Cin axis zero-padded to kp per tap."""
    kh, kw, cin, cout = w_hwio.shape
    w9 = jnp.asarray(w_hwio, jnp.float32).reshape(kh * kw, cin, cout)
    wp = jnp.zeros((kh * kw, kp, cout), jnp.float32).at[:, :cin, :].set(w9)
    return wp.reshape(kh * kw * kp, cout).T.astype(MXU_DTYPE)           # (Cout, 9*kp)


def _tap_masks(H, W):
    """(9, 1, HW) 0/1 masks: mask[t, 0, p] = 1 iff source pixel p+(oy,ox) is inside the image."""
    y = np.arange(H * W) // W
    x = np.arange(H * W) % W
    masks = np.zeros((9, 1, H * W), np.float32)
    t = 0
    for oy in (-1, 0, 1):
        for ox in (-1, 0, 1):
            valid = (y + oy >= 0) & (y + oy < H) & (x + ox >= 0) & (x + ox < W)
            masks[t, 0] = valid.astype(np.float32)
            t += 1
    return jnp.asarray(masks)


def residual_block(x_nchw, params):
    """ResidualBlock.forward(input) with t_emb=None, z_emb=None (single fused Pallas kernel)."""
    B, Cin, H, W = x_nchw.shape
    Cout = params["w1"].shape[-1]
    HW = H * W
    G1, G2 = params["num_groups"]
    assert Cin % G1 == 0 and Cout % G2 == 0

    kalign = 16 if MXU_DTYPE == jnp.bfloat16 else 8   # bf16 packs 2 rows / 32-bit sublane
    KP1 = _round_up(Cin, kalign)                      # per-tap K stride for conv1
    KP2 = _round_up(Cout, kalign)                     # per-tap K stride for conv2
    KPMAX = max(KP1, KP2)
    CACT = _round_up(max(Cin, Cout), 8)               # act scratch rows
    CP = _round_up(max(Cin, Cout), 8)                 # packed per-channel param rows
    PAD = _round_up(W + 1, 128)                       # lane pad: centre store stays 128-aligned
    HWP = HW + 2 * PAD

    # NCHW -> (B, C, HW) is a free reshape (no transpose through HBM).
    x3 = x_nchw.reshape(B, Cin, HW).astype(jnp.float32)

    # Tiny parameter repacks (constant-folded under jit).
    w1p = _pack_conv_weight(params["w1"], KP1)
    w2p = _pack_conv_weight(params["w2"], KP2)
    wskipT = jnp.transpose(params["wskip"]).astype(MXU_DTYPE)            # (Cout, Cin)

    pvec = jnp.zeros((CP, 8), jnp.float32)
    pvec = pvec.at[:Cin, 0].set(params["gamma1"].astype(jnp.float32))
    pvec = pvec.at[:Cin, 1].set(params["beta1"].astype(jnp.float32))
    pvec = pvec.at[:Cout, 2].set(params["gamma2"].astype(jnp.float32))
    pvec = pvec.at[:Cout, 3].set(params["beta2"].astype(jnp.float32))
    pvec = pvec.at[:Cout, 4].set(params["b1"].astype(jnp.float32))
    pvec = pvec.at[:Cout, 5].set(params["b2"].astype(jnp.float32))

    tapmask = _tap_masks(H, W)

    kernel = _make_resblock_kernel(H, W, Cin, Cout, G1, G2, KP1, KP2, PAD)

    # Explicit VMEM budget (double-buffered blocks + weights + scratch) with headroom,
    # clamped to the smallest physical VMEM across generations (v7x: 64 MiB).
    bpe = 2 if MXU_DTYPE == jnp.bfloat16 else 4
    est = (2 * Cin * HW * 4 + 2 * Cout * HW * 4              # x / out blocks
           + 2 * 9 * HW * 4 + 2 * CP * 128 * 4               # tap masks, packed params
           + 2 * (Cout * 9 * KP1 + Cout * 9 * KP2 + Cout * max(Cin, 8)) * bpe
           + CACT * HWP * 4 + 9 * KPMAX * HW * bpe)          # scratch
    vmem_limit = int(min(64 * 2**20, max(16 * 2**20, 2 * est + (2 << 20))))

    out3 = pl.pallas_call(
        kernel,
        out_shape=jax.ShapeDtypeStruct((B, Cout, HW), jnp.float32),
        grid_spec=pltpu.PrefetchScalarGridSpec(
            num_scalar_prefetch=0,
            grid=(B,),
            in_specs=[
                pl.BlockSpec((1, Cin, HW), lambda b: (b, 0, 0)),          # x
                pl.BlockSpec((9, 1, HW), lambda b: (0, 0, 0)),            # tap validity masks
                pl.BlockSpec((CP, 8), lambda b: (0, 0)),                  # packed per-channel params
                pl.BlockSpec((Cout, 9 * KP1), lambda b: (0, 0)),          # packed w1
                pl.BlockSpec((Cout, 9 * KP2), lambda b: (0, 0)),          # packed w2
                pl.BlockSpec((Cout, Cin), lambda b: (0, 0)),              # skip weight
            ],
            out_specs=pl.BlockSpec((1, Cout, HW), lambda b: (b, 0, 0)),
            scratch_shapes=[
                pltpu.VMEM((CACT, HWP), jnp.float32),                     # lane-padded activation
                pltpu.VMEM((9 * KPMAX, HW), MXU_DTYPE),                   # packed conv taps (bf16)
            ]),
        compiler_params=pltpu.CompilerParams(
            dimension_semantics=("parallel",),
            vmem_limit_bytes=vmem_limit),
    )(x3, tapmask, pvec, w1p, w2p, wskipT)

    return out3.reshape(B, Cout, H, W)                                    # free reshape back


# ----------------------------------------------------------------------------- params / reference

def init_params(key, Cin, Cout):
    G1 = max(1, min(Cin // 4, 32))
    G2 = max(1, min(Cout // 4, 32))
    ks = jax.random.split(key, 9)
    return dict(
        gamma1=1.0 + 0.1 * jax.random.normal(ks[0], (Cin,), jnp.float32),
        beta1=0.1 * jax.random.normal(ks[1], (Cin,), jnp.float32),
        gamma2=1.0 + 0.1 * jax.random.normal(ks[2], (Cout,), jnp.float32),
        beta2=0.1 * jax.random.normal(ks[3], (Cout,), jnp.float32),
        w1=jax.random.normal(ks[4], (3, 3, Cin, Cout), jnp.float32) / np.sqrt(9 * Cin),
        b1=0.05 * jax.random.normal(ks[5], (Cout,), jnp.float32),
        # NOTE: original conv2 uses init_scale=0.0; random init here so the test is nontrivial.
        w2=jax.random.normal(ks[6], (3, 3, Cout, Cout), jnp.float32) / np.sqrt(9 * Cout),
        b2=0.05 * jax.random.normal(ks[7], (Cout,), jnp.float32),
        wskip=jax.random.normal(ks[8], (Cin, Cout), jnp.float32) / np.sqrt(Cin),
        num_groups=(G1, G2),
    )


def reference(x_nchw, p):
    """Plain-JAX reference mirroring the PyTorch forward (validation only)."""
    x = jnp.transpose(x_nchw, (0, 2, 3, 1)).astype(jnp.float32)
    G1, G2 = p["num_groups"]

    def gn(h, gamma, beta, G):
        B, H, W, C = h.shape
        hg = h.reshape(B, H * W, G, C // G)
        mu = hg.mean(axis=(1, 3), keepdims=True)
        var = ((hg - mu) ** 2).mean(axis=(1, 3), keepdims=True)
        hn = ((hg - mu) / jnp.sqrt(var + GN_EPS)).reshape(B, H, W, C)
        return hn * gamma + beta

    def act(h):
        return jnp.where(h >= 0.0, h, LEAKY_SLOPE * h)

    def conv(h, w, b):
        return lax.conv_general_dilated(h, w, (1, 1), ((1, 1), (1, 1)),
                                        dimension_numbers=("NHWC", "HWIO", "NHWC")) + b

    h = act(gn(x, p["gamma1"], p["beta1"], G1))
    h = conv(h, p["w1"], p["b1"])
    h = act(gn(h, p["gamma2"], p["beta2"], G2))
    h = conv(h, p["w2"], p["b2"])
    skip = jnp.einsum("bhwc,co->bhwo", x, p["wskip"])
    out = (h + skip) * INV_SQRT2
    return jnp.transpose(out, (0, 3, 1, 2))


# ----------------------------------------------------------------------------- main

if __name__ == "__main__":
    key = jax.random.PRNGKey(0)
    B, Cin, Cout, H, W = 2, 4, 8, 16, 16

    params = init_params(key, Cin, Cout)
    x = jax.random.normal(jax.random.fold_in(key, 123), (B, Cin, H, W), jnp.float32)

    fwd = jax.jit(lambda xx: residual_block(xx, params))
    out = jax.block_until_ready(fwd(x))

    assert out.shape == (B, Cout, H, W), out.shape

    ref = reference(x, params)
    err = float(jnp.max(jnp.abs(out - ref)))
    # Tolerance sized for bfloat16 MXU operands (f32 accumulation, f32 reference weights).
    rel = 3e-2 if MXU_DTYPE == jnp.bfloat16 else 1e-3
    tol = rel * (1.0 + float(jnp.max(jnp.abs(ref))))
    if err > tol:
        raise SystemExit(f"mismatch vs reference: max abs err {err} (tol {tol})")

    print("KERNEL_OK")
</pallas_src>

<mosaic_0001>
module attributes {stable_mosaic.version = 11 : i64} {
  func.func @kernel(%arg0: i32, %arg1: memref<1x4x256xf32, #tpu.memory_space<vmem>>, %arg2: memref<9x1x256xf32, #tpu.memory_space<vmem>>, %arg3: memref<8x8xf32, #tpu.memory_space<vmem>>, %arg4: memref<8x144xbf16, #tpu.memory_space<vmem>>, %arg5: memref<8x144xbf16, #tpu.memory_space<vmem>>, %arg6: memref<8x4xbf16, #tpu.memory_space<vmem>>, %arg7: memref<1x8x256xf32, #tpu.memory_space<vmem>>, %arg8: memref<8x512xf32, #tpu.memory_space<vmem>>, %arg9: memref<144x256xbf16, #tpu.memory_space<vmem>>) attributes {dimension_semantics = [#tpu.dimension_semantics<parallel>], iteration_bounds = array<i64: 2>, scalar_prefetch = 0 : i64, scratch_operands = 2 : i64, tpu.core_type = #tpu.core_type<tc>, window_params = [{transform_indices = @transform_0, window_bounds = array<i64: 1, 4, 256>}, {pipeline_mode = #tpu.pipeline_mode<synchronous>, transform_indices = @transform_1, window_bounds = array<i64: 9, 1, 256>}, {pipeline_mode = #tpu.pipeline_mode<synchronous>, transform_indices = @transform_2, window_bounds = array<i64: 8, 8>}, {pipeline_mode = #tpu.pipeline_mode<synchronous>, transform_indices = @transform_3, window_bounds = array<i64: 8, 144>}, {pipeline_mode = #tpu.pipeline_mode<synchronous>, transform_indices = @transform_4, window_bounds = array<i64: 8, 144>}, {pipeline_mode = #tpu.pipeline_mode<synchronous>, transform_indices = @transform_5, window_bounds = array<i64: 8, 4>}, {transform_indices = @transform_6, window_bounds = array<i64: 1, 8, 256>}]} {
    %c0 = arith.constant 0 : index
    %c0_0 = arith.constant 0 : index
    %c0_1 = arith.constant 0 : index
    %0 = vector.load %arg1[%c0, %c0_0, %c0_1] : memref<1x4x256xf32, #tpu.memory_space<vmem>>, vector<1x4x256xf32>
    %1 = vector.shape_cast %0 : vector<1x4x256xf32> to vector<4x256xf32>
    %2 = arith.truncf %1 : vector<4x256xf32> to vector<4x256xbf16>
    %c0_2 = arith.constant 0 : index
    %c0_3 = arith.constant 0 : index
    %3 = vector.load %arg3[%c0_2, %c0_3] : memref<8x8xf32, #tpu.memory_space<vmem>>, vector<4x1xf32>
    %c0_4 = arith.constant 0 : index
    %c1 = arith.constant 1 : index
    %4 = vector.load %arg3[%c0_4, %c1] : memref<8x8xf32, #tpu.memory_space<vmem>>, vector<4x1xf32>
    %c0_5 = arith.constant 0 : index
    %c2 = arith.constant 2 : index
    %5 = vector.load %arg3[%c0_5, %c2] : memref<8x8xf32, #tpu.memory_space<vmem>>, vector<8x1xf32>
    %c0_6 = arith.constant 0 : index
    %c3 = arith.constant 3 : index
    %6 = vector.load %arg3[%c0_6, %c3] : memref<8x8xf32, #tpu.memory_space<vmem>>, vector<8x1xf32>
    %c0_7 = arith.constant 0 : index
    %c4 = arith.constant 4 : index
    %7 = vector.load %arg3[%c0_7, %c4] : memref<8x8xf32, #tpu.memory_space<vmem>>, vector<8x1xf32>
    %c0_8 = arith.constant 0 : index
    %c5 = arith.constant 5 : index
    %8 = vector.load %arg3[%c0_8, %c5] : memref<8x8xf32, #tpu.memory_space<vmem>>, vector<8x1xf32>
    %cst = arith.constant dense<0.000000e+00> : vector<4xf32>
    %9 = vector.multi_reduction <add>, %1, %cst [1] : vector<4x256xf32> to vector<4xf32>
    %10 = vector.shape_cast %9 : vector<4xf32> to vector<4x1xf32>
    %11 = arith.mulf %1, %1 : vector<4x256xf32>
    %cst_9 = arith.constant dense<0.000000e+00> : vector<4xf32>
    %12 = vector.multi_reduction <add>, %11, %cst_9 [1] : vector<4x256xf32> to vector<4xf32>
    %13 = vector.shape_cast %12 : vector<4xf32> to vector<4x1xf32>
    %14 = tpu.iota {dimensions = array<i32: 0>} : vector<4x1xi32>
    %cst_10 = arith.constant 0.000000e+00 : f32
    %15 = vector.broadcast %cst_10 : f32 to vector<4x1xf32>
    %cst_11 = arith.constant 0.000000e+00 : f32
    %16 = vector.broadcast %cst_11 : f32 to vector<4x1xf32>
    %c0_i32 = arith.constant 0 : i32
    %17 = vector.broadcast %c0_i32 : i32 to vector<4x1xi32>
    %18 = arith.cmpi sge, %14, %17 : vector<4x1xi32>
    %c4_i32 = arith.constant 4 : i32
    %19 = vector.broadcast %c4_i32 : i32 to vector<4x1xi32>
    %20 = arith.cmpi slt, %14, %19 : vector<4x1xi32>
    %21 = arith.andi %18, %20 : vector<4x1xi1>
    %22 = arith.extui %21 : vector<4x1xi1> to vector<4x1xi32>
    %23 = arith.sitofp %22 : vector<4x1xi32> to vector<4x1xf32>
    %24 = arith.mulf %23, %10 : vector<4x1xf32>
    %cst_12 = arith.constant dense<0.000000e+00> : vector<1xf32>
    %25 = vector.multi_reduction <add>, %24, %cst_12 [0] : vector<4x1xf32> to vector<1xf32>
    %26 = vector.shape_cast %25 : vector<1xf32> to vector<1x1xf32>
    %cst_13 = arith.constant 9.765625E-4 : f32
    %27 = vector.broadcast %cst_13 : f32 to vector<1x1xf32>
    %28 = arith.mulf %26, %27 : vector<1x1xf32>
    %29 = vector.broadcast %28 : vector<1x1xf32> to vector<4x1xf32>
    %30 = arith.mulf %23, %29 : vector<4x1xf32>
    %31 = arith.addf %15, %30 : vector<4x1xf32>
    %32 = arith.mulf %23, %13 : vector<4x1xf32>
    %cst_14 = arith.constant dense<0.000000e+00> : vector<1xf32>
    %33 = vector.multi_reduction <add>, %32, %cst_14 [0] : vector<4x1xf32> to vector<1xf32>
    %34 = vector.shape_cast %33 : vector<1xf32> to vector<1x1xf32>
    %cst_15 = arith.constant 9.765625E-4 : f32
    %35 = vector.broadcast %cst_15 : f32 to vector<1x1xf32>
    %36 = arith.mulf %34, %35 : vector<1x1xf32>
    %37 = vector.broadcast %36 : vector<1x1xf32> to vector<4x1xf32>
    %38 = arith.mulf %23, %37 : vector<4x1xf32>
    %39 = arith.addf %16, %38 : vector<4x1xf32>
    %40 = arith.mulf %31, %31 : vector<4x1xf32>
    %41 = arith.subf %39, %40 : vector<4x1xf32>
    %cst_16 = arith.constant 9.99999997E-7 : f32
    %42 = vector.broadcast %cst_16 : f32 to vector<4x1xf32>
    %43 = arith.addf %41, %42 : vector<4x1xf32>
    %44 = math.rsqrt %43 : vector<4x1xf32>
    %45 = arith.mulf %3, %44 : vector<4x1xf32>
    %46 = arith.mulf %31, %45 : vector<4x1xf32>
    %47 = arith.subf %4, %46 : vector<4x1xf32>
    %48 = vector.broadcast %45 : vector<4x1xf32> to vector<4x256xf32>
    %49 = arith.mulf %1, %48 : vector<4x256xf32>
    %50 = vector.broadcast %47 : vector<4x1xf32> to vector<4x256xf32>
    %51 = arith.addf %49, %50 : vector<4x256xf32>
    %cst_17 = arith.constant 0.000000e+00 : f32
    %52 = vector.broadcast %cst_17 : f32 to vector<4x256xf32>
    %53 = arith.cmpf oge, %51, %52 : vector<4x256xf32>
    %cst_18 = arith.constant 2.000000e-01 : f32
    %54 = vector.broadcast %cst_18 : f32 to vector<4x256xf32>
    %55 = arith.mulf %54, %51 : vector<4x256xf32>
    %56 = arith.select %53, %51, %55 : vector<4x256xi1>, vector<4x256xf32>
    %c0_19 = arith.constant 0 : index
    %c128 = arith.constant 128 : index
    %57 = vector.load %arg8[%c0_19, %c128] : memref<8x512xf32, #tpu.memory_space<vmem>>, vector<4x256xf32>
    tpu.vector_store %arg8[%c0_19, %c128], %56 {strides = array<i32>} : memref<8x512xf32, #tpu.memory_space<vmem>>, vector<4x256xf32>,
    %c0_20 = arith.constant 0 : index
    %c111 = arith.constant 111 : index
    %58 = vector.load %arg8[%c0_20, %c111] : memref<8x512xf32, #tpu.memory_space<vmem>>, vector<4x256xf32>
    %c0_21 = arith.constant 0 : index
    %c0_22 = arith.constant 0 : index
    %c0_23 = arith.constant 0 : index
    %59 = vector.load %arg2[%c0_21, %c0_22, %c0_23] : memref<9x1x256xf32, #tpu.memory_space<vmem>>, vector<1x1x256xf32>
    %60 = vector.shape_cast %59 : vector<1x1x256xf32> to vector<1x256xf32>
    %cst_24 = arith.constant 0.000000e+00 : f32
    %61 = vector.broadcast %cst_24 : f32 to vector<1x256xf32>
    %62 = arith.cmpf one, %60, %61 : vector<1x256xf32>
    %cst_25 = arith.constant 0.000000e+00 : f32
    %63 = vector.shape_cast %62 : vector<1x256xi1> to vector<1x256xi1>
    %64 = vector.broadcast %63 : vector<1x256xi1> to vector<4x256xi1>
    %65 = vector.broadcast %cst_25 : f32 to vector<4x256xf32>
    %66 = arith.select %64, %58, %65 : vector<4x256xi1>, vector<4x256xf32>
    %67 = arith.truncf %66 : vector<4x256xf32> to vector<4x256xbf16>
    %c0_26 = arith.constant 0 : index
    %c0_27 = arith.constant 0 : index
    %68 = vector.load %arg9[%c0_26, %c0_27] : memref<144x256xbf16, #tpu.memory_space<vmem>>, vector<4x256xbf16>
    tpu.vector_store %arg9[%c0_26, %c0_27], %67 {strides = array<i32>} : memref<144x256xbf16, #tpu.memory_space<vmem>>, vector<4x256xbf16>,
    %cst_28 = arith.constant 0.000000e+00 : bf16
    %69 = vector.broadcast %cst_28 : bf16 to vector<12x256xbf16>
    %c4_29 = arith.constant 4 : index
    %c0_30 = arith.constant 0 : index
    %70 = vector.load %arg9[%c4_29, %c0_30] : memref<144x256xbf16, #tpu.memory_space<vmem>>, vector<12x256xbf16>
    tpu.vector_store %arg9[%c4_29, %c0_30], %69 {strides = array<i32>} : memref<144x256xbf16, #tpu.memory_space<vmem>>, vector<12x256xbf16>,
    %c0_31 = arith.constant 0 : index
    %c112 = arith.constant 112 : index
    %71 = vector.load %arg8[%c0_31, %c112] : memref<8x512xf32, #tpu.memory_space<vmem>>, vector<4x256xf32>
    %c1_32 = arith.constant 1 : index
    %c0_33 = arith.constant 0 : index
    %c0_34 = arith.constant 0 : index
    %72 = vector.load %arg2[%c1_32, %c0_33, %c0_34] : memref<9x1x256xf32, #tpu.memory_space<vmem>>, vector<1x1x256xf32>
    %73 = vector.shape_cast %72 : vector<1x1x256xf32> to vector<1x256xf32>
    %cst_35 = arith.constant 0.000000e+00 : f32
    %74 = vector.broadcast %cst_35 : f32 to vector<1x256xf32>
    %75 = arith.cmpf one, %73, %74 : vector<1x256xf32>
    %cst_36 = arith.constant 0.000000e+00 : f32
    %76 = vector.shape_cast %75 : vector<1x256xi1> to vector<1x256xi1>
    %77 = vector.broadcast %76 : vector<1x256xi1> to vector<4x256xi1>
    %78 = vector.broadcast %cst_36 : f32 to vector<4x256xf32>
    %79 = arith.select %77, %71, %78 : vector<4x256xi1>, vector<4x256xf32>
    %80 = arith.truncf %79 : vector<4x256xf32> to vector<4x256xbf16>
    %c16 = arith.constant 16 : index
    %c0_37 = arith.constant 0 : index
    %81 = vector.load %arg9[%c16, %c0_37] : memref<144x256xbf16, #tpu.memory_space<vmem>>, vector<4x256xbf16>
    tpu.vector_store %arg9[%c16, %c0_37], %80 {strides = array<i32>} : memref<144x256xbf16, #tpu.memory_space<vmem>>, vector<4x256xbf16>,
    %cst_38 = arith.constant 0.000000e+00 : bf16
    %82 = vector.broadcast %cst_38 : bf16 to vector<12x256xbf16>
    %c20 = arith.constant 20 : index
    %c0_39 = arith.constant 0 : index
    %83 = vector.load %arg9[%c20, %c0_39] : memref<144x256xbf16, #tpu.memory_space<vmem>>, vector<12x256xbf16>
    tpu.vector_store %arg9[%c20, %c0_39], %82 {strides = array<i32>} : memref<144x256xbf16, #tpu.memory_space<vmem>>, vector<12x256xbf16>,
    %c0_40 = arith.constant 0 : index
    %c113 = arith.constant 113 : index
    %84 = vector.load %arg8[%c0_40, %c113] : memref<8x512xf32, #tpu.memory_space<vmem>>, vector<4x256xf32>
    %c2_41 = arith.constant 2 : index
    %c0_42 = arith.constant 0 : index
    %c0_43 = arith.constant 0 : index
    %85 = vector.load %arg2[%c2_41, %c0_42, %c0_43] : memref<9x1x256xf32, #tpu.memory_space<vmem>>, vector<1x1x256xf32>
    %86 = vector.shape_cast %85 : vector<1x1x256xf32> to vector<1x256xf32>
    %cst_44 = arith.constant 0.000000e+00 : f32
    %87 = vector.broadcast %cst_44 : f32 to vector<1x256xf32>
    %88 = arith.cmpf one, %86, %87 : vector<1x256xf32>
    %cst_45 = arith.constant 0.000000e+00 : f32
    %89 = vector.shape_cast %88 : vector<1x256xi1> to vector<1x256xi1>
    %90 = vector.broadcast %89 : vector<1x256xi1> to vector<4x256xi1>
    %91 = vector.broadcast %cst_45 : f32 to vector<4x256xf32>
    %92 = arith.select %90, %84, %91 : vector<4x256xi1>, vector<4x256xf32>
    %93 = arith.truncf %92 : vector<4x256xf32> to vector<4x256xbf16>
    %c32 = arith.constant 32 : index
    %c0_46 = arith.constant 0 : index
    %94 = vector.load %arg9[%c32, %c0_46] : memref<144x256xbf16, #tpu.memory_space<vmem>>, vector<4x256xbf16>
    tpu.vector_store %arg9[%c32, %c0_46], %93 {strides = array<i32>} : memref<144x256xbf16, #tpu.memory_space<vmem>>, vector<4x256xbf16>,
    %cst_47 = arith.constant 0.000000e+00 : bf16
    %95 = vector.broadcast %cst_47 : bf16 to vector<12x256xbf16>
    %c36 = arith.constant 36 : index
    %c0_48 = arith.constant 0 : index
    %96 = vector.load %arg9[%c36, %c0_48] : memref<144x256xbf16, #tpu.memory_space<vmem>>, vector<12x256xbf16>
    tpu.vector_store %arg9[%c36, %c0_48], %95 {strides = array<i32>} : memref<144x256xbf16, #tpu.memory_space<vmem>>, vector<12x256xbf16>,
    %c0_49 = arith.constant 0 : index
    %c127 = arith.constant 127 : index
    %97 = vector.load %arg8[%c0_49, %c127] : memref<8x512xf32, #tpu.memory_space<vmem>>, vector<4x256xf32>
    %c3_50 = arith.constant 3 : index
    %c0_51 = arith.constant 0 : index
    %c0_52 = arith.constant 0 : index
    %98 = vector.load %arg2[%c3_50, %c0_51, %c0_52] : memref<9x1x256xf32, #tpu.memory_space<vmem>>, vector<1x1x256xf32>
    %99 = vector.shape_cast %98 : vector<1x1x256xf32> to vector<1x256xf32>
    %cst_53 = arith.constant 0.000000e+00 : f32
    %100 = vector.broadcast %cst_53 : f32 to vector<1x256xf32>
    %101 = arith.cmpf one, %99, %100 : vector<1x256xf32>
    %cst_54 = arith.constant 0.000000e+00 : f32
    %102 = vector.shape_cast %101 : vector<1x256xi1> to vector<1x256xi1>
    %103 = vector.broadcast %102 : vector<1x256xi1> to vector<4x256xi1>
    %104 = vector.broadcast %cst_54 : f32 to vector<4x256xf32>
    %105 = arith.select %103, %97, %104 : vector<4x256xi1>, vector<4x256xf32>
    %106 = arith.truncf %105 : vector<4x256xf32> to vector<4x256xbf16>
    %c48 = arith.constant 48 : index
    %c0_55 = arith.constant 0 : index
    %107 = vector.load %arg9[%c48, %c0_55] : memref<144x256xbf16, #tpu.memory_space<vmem>>, vector<4x256xbf16>
    tpu.vector_store %arg9[%c48, %c0_55], %106 {strides = array<i32>} : memref<144x256xbf16, #tpu.memory_space<vmem>>, vector<4x256xbf16>,
    %cst_56 = arith.constant 0.000000e+00 : bf16
    %108 = vector.broadcast %cst_56 : bf16 to vector<12x256xbf16>
    %c52 = arith.constant 52 : index
    %c0_57 = arith.constant 0 : index
    %109 = vector.load %arg9[%c52, %c0_57] : memref<144x256xbf16, #tpu.memory_space<vmem>>, vector<12x256xbf16>
    tpu.vector_store %arg9[%c52, %c0_57], %108 {strides = array<i32>} : memref<144x256xbf16, #tpu.memory_space<vmem>>, vector<12x256xbf16>,
    %c0_58 = arith.constant 0 : index
    %c128_59 = arith.constant 128 : index
    %110 = vector.load %arg8[%c0_58, %c128_59] : memref<8x512xf32, #tpu.memory_space<vmem>>, vector<4x256xf32>
    %111 = arith.truncf %110 : vector<4x256xf32> to vector<4x256xbf16>
    %c64 = arith.constant 64 : index
    %c0_60 = arith.constant 0 : index
    %112 = vector.load %arg9[%c64, %c0_60] : memref<144x256xbf16, #tpu.memory_space<vmem>>, vector<4x256xbf16>
    tpu.vector_store %arg9[%c64, %c0_60], %111 {strides = array<i32>} : memref<144x256xbf16, #tpu.memory_space<vmem>>, vector<4x256xbf16>,
    %cst_61 = arith.constant 0.000000e+00 : bf16
    %113 = vector.broadcast %cst_61 : bf16 to vector<12x256xbf16>
    %c68 = arith.constant 68 : index
    %c0_62 = arith.constant 0 : index
    %114 = vector.load %arg9[%c68, %c0_62] : memref<144x256xbf16, #tpu.memory_space<vmem>>, vector<12x256xbf16>
    tpu.vector_store %arg9[%c68, %c0_62], %113 {strides = array<i32>} : memref<144x256xbf16, #tpu.memory_space<vmem>>, vector<12x256xbf16>,
    %c0_63 = arith.constant 0 : index
    %c129 = arith.constant 129 : index
    %115 = vector.load %arg8[%c0_63, %c129] : memref<8x512xf32, #tpu.memory_space<vmem>>, vector<4x256xf32>
    %c5_64 = arith.constant 5 : index
    %c0_65 = arith.constant 0 : index
    %c0_66 = arith.constant 0 : index
    %116 = vector.load %arg2[%c5_64, %c0_65, %c0_66] : memref<9x1x256xf32, #tpu.memory_space<vmem>>, vector<1x1x256xf32>
    %117 = vector.shape_cast %116 : vector<1x1x256xf32> to vector<1x256xf32>
    %cst_67 = arith.constant 0.000000e+00 : f32
    %118 = vector.broadcast %cst_67 : f32 to vector<1x256xf32>
    %119 = arith.cmpf one, %117, %118 : vector<1x256xf32>
    %cst_68 = arith.constant 0.000000e+00 : f32
    %120 = vector.shape_cast %119 : vector<1x256xi1> to vector<1x256xi1>
    %121 = vector.broadcast %120 : vector<1x256xi1> to vector<4x256xi1>
    %122 = vector.broadcast %cst_68 : f32 to vector<4x256xf32>
    %123 = arith.select %121, %115, %122 : vector<4x256xi1>, vector<4x256xf32>
    %124 = arith.truncf %123 : vector<4x256xf32> to vector<4x256xbf16>
    %c80 = arith.constant 80 : index
    %c0_69 = arith.constant 0 : index
    %125 = vector.load %arg9[%c80, %c0_69] : memref<144x256xbf16, #tpu.memory_space<vmem>>, vector<4x256xbf16>
    tpu.vector_store %arg9[%c80, %c0_69], %124 {strides = array<i32>} : memref<144x256xbf16, #tpu.memory_space<vmem>>, vector<4x256xbf16>,
    %cst_70 = arith.constant 0.000000e+00 : bf16
    %126 = vector.broadcast %cst_70 : bf16 to vector<12x256xbf16>
    %c84 = arith.constant 84 : index
    %c0_71 = arith.constant 0 : index
    %127 = vector.load %arg9[%c84, %c0_71] : memref<144x256xbf16, #tpu.memory_space<vmem>>, vector<12x256xbf16>
    tpu.vector_store %arg9[%c84, %c0_71], %126 {strides = array<i32>} : memref<144x256xbf16, #tpu.memory_space<vmem>>, vector<12x256xbf16>,
    %c0_72 = arith.constant 0 : index
    %c143 = arith.constant 143 : index
    %128 = vector.load %arg8[%c0_72, %c143] : memref<8x512xf32, #tpu.memory_space<vmem>>, vector<4x256xf32>
    %c6 = arith.constant 6 : index
    %c0_73 = arith.constant 0 : index
    %c0_74 = arith.constant 0 : index
    %129 = vector.load %arg2[%c6, %c0_73, %c0_74] : memref<9x1x256xf32, #tpu.memory_space<vmem>>, vector<1x1x256xf32>
    %130 = vector.shape_cast %129 : vector<1x1x256xf32> to vector<1x256xf32>
    %cst_75 = arith.constant 0.000000e+00 : f32
    %131 = vector.broadcast %cst_75 : f32 to vector<1x256xf32>
    %132 = arith.cmpf one, %130, %131 : vector<1x256xf32>
    %cst_76 = arith.constant 0.000000e+00 : f32
    %133 = vector.shape_cast %132 : vector<1x256xi1> to vector<1x256xi1>
    %134 = vector.broadcast %133 : vector<1x256xi1> to vector<4x256xi1>
    %135 = vector.broadcast %cst_76 : f32 to vector<4x256xf32>
    %136 = arith.select %134, %128, %135 : vector<4x256xi1>, vector<4x256xf32>
    %137 = arith.truncf %136 : vector<4x256xf32> to vector<4x256xbf16>
    %c96 = arith.constant 96 : index
    %c0_77 = arith.constant 0 : index
    %138 = vector.load %arg9[%c96, %c0_77] : memref<144x256xbf16, #tpu.memory_space<vmem>>, vector<4x256xbf16>
    tpu.vector_store %arg9[%c96, %c0_77], %137 {strides = array<i32>} : memref<144x256xbf16, #tpu.memory_space<vmem>>, vector<4x256xbf16>,
    %cst_78 = arith.constant 0.000000e+00 : bf16
    %139 = vector.broadcast %cst_78 : bf16 to vector<12x256xbf16>
    %c100 = arith.constant 100 : index
    %c0_79 = arith.constant 0 : index
    %140 = vector.load %arg9[%c100, %c0_79] : memref<144x256xbf16, #tpu.memory_space<vmem>>, vector<12x256xbf16>
    tpu.vector_store %arg9[%c100, %c0_79], %139 {strides = array<i32>} : memref<144x256xbf16, #tpu.memory_space<vmem>>, vector<12x256xbf16>,
    %c0_80 = arith.constant 0 : index
    %c144 = arith.constant 144 : index
    %141 = vector.load %arg8[%c0_80, %c144] : memref<8x512xf32, #tpu.memory_space<vmem>>, vector<4x256xf32>
    %c7 = arith.constant 7 : index
    %c0_81 = arith.constant 0 : index
    %c0_82 = arith.constant 0 : index
    %142 = vector.load %arg2[%c7, %c0_81, %c0_82] : memref<9x1x256xf32, #tpu.memory_space<vmem>>, vector<1x1x256xf32>
    %143 = vector.shape_cast %142 : vector<1x1x256xf32> to vector<1x256xf32>
    %cst_83 = arith.constant 0.000000e+00 : f32
    %144 = vector.broadcast %cst_83 : f32 to vector<1x256xf32>
    %145 = arith.cmpf one, %143, %144 : vector<1x256xf32>
    %cst_84 = arith.constant 0.000000e+00 : f32
    %146 = vector.shape_cast %145 : vector<1x256xi1> to vector<1x256xi1>
    %147 = vector.broadcast %146 : vector<1x256xi1> to vector<4x256xi1>
    %148 = vector.broadcast %cst_84 : f32 to vector<4x256xf32>
    %149 = arith.select %147, %141, %148 : vector<4x256xi1>, vector<4x256xf32>
    %150 = arith.truncf %149 : vector<4x256xf32> to vector<4x256xbf16>
    %c112_85 = arith.constant 112 : index
    %c0_86 = arith.constant 0 : index
    %151 = vector.load %arg9[%c112_85, %c0_86] : memref<144x256xbf16, #tpu.memory_space<vmem>>, vector<4x256xbf16>
    tpu.vector_store %arg9[%c112_85, %c0_86], %150 {strides = array<i32>} : memref<144x256xbf16, #tpu.memory_space<vmem>>, vector<4x256xbf16>,
    %cst_87 = arith.constant 0.000000e+00 : bf16
    %152 = vector.broadcast %cst_87 : bf16 to vector<12x256xbf16>
    %c116 = arith.constant 116 : index
    %c0_88 = arith.constant 0 : index
    %153 = vector.load %arg9[%c116, %c0_88] : memref<144x256xbf16, #tpu.memory_space<vmem>>, vector<12x256xbf16>
    tpu.vector_store %arg9[%c116, %c0_88], %152 {strides = array<i32>} : memref<144x256xbf16, #tpu.memory_space<vmem>>, vector<12x256xbf16>,
    %c0_89 = arith.constant 0 : index
    %c145 = arith.constant 145 : index
    %154 = vector.load %arg8[%c0_89, %c145] : memref<8x512xf32, #tpu.memory_space<vmem>>, vector<4x256xf32>
    %c8 = arith.constant 8 : index
    %c0_90 = arith.constant 0 : index
    %c0_91 = arith.constant 0 : index
    %155 = vector.load %arg2[%c8, %c0_90, %c0_91] : memref<9x1x256xf32, #tpu.memory_space<vmem>>, vector<1x1x256xf32>
    %156 = vector.shape_cast %155 : vector<1x1x256xf32> to vector<1x256xf32>
    %cst_92 = arith.constant 0.000000e+00 : f32
    %157 = vector.broadcast %cst_92 : f32 to vector<1x256xf32>
    %158 = arith.cmpf one, %156, %157 : vector<1x256xf32>
    %cst_93 = arith.constant 0.000000e+00 : f32
    %159 = vector.shape_cast %158 : vector<1x256xi1> to vector<1x256xi1>
    %160 = vector.broadcast %159 : vector<1x256xi1> to vector<4x256xi1>
    %161 = vector.broadcast %cst_93 : f32 to vector<4x256xf32>
    %162 = arith.select %160, %154, %161 : vector<4x256xi1>, vector<4x256xf32>
    %163 = arith.truncf %162 : vector<4x256xf32> to vector<4x256xbf16>
    %c128_94 = arith.constant 128 : index
    %c0_95 = arith.constant 0 : index
    %164 = vector.load %arg9[%c128_94, %c0_95] : memref<144x256xbf16, #tpu.memory_space<vmem>>, vector<4x256xbf16>
    tpu.vector_store %arg9[%c128_94, %c0_95], %163 {strides = array<i32>} : memref<144x256xbf16, #tpu.memory_space<vmem>>, vector<4x256xbf16>,
    %cst_96 = arith.constant 0.000000e+00 : bf16
    %165 = vector.broadcast %cst_96 : bf16 to vector<12x256xbf16>
    %c132 = arith.constant 132 : index
    %c0_97 = arith.constant 0 : index
    %166 = vector.load %arg9[%c132, %c0_97] : memref<144x256xbf16, #tpu.memory_space<vmem>>, vector<12x256xbf16>
    tpu.vector_store %arg9[%c132, %c0_97], %165 {strides = array<i32>} : memref<144x256xbf16, #tpu.memory_space<vmem>>, vector<12x256xbf16>,
    %c0_98 = arith.constant 0 : index
    %c0_99 = arith.constant 0 : index
    %167 = vector.load %arg4[%c0_98, %c0_99] : memref<8x144xbf16, #tpu.memory_space<vmem>>, vector<8x144xbf16>
    %c0_100 = arith.constant 0 : index
    %c0_101 = arith.constant 0 : index
    %168 = vector.load %arg9[%c0_100, %c0_101] : memref<144x256xbf16, #tpu.memory_space<vmem>>, vector<144x256xbf16>
    %cst_102 = arith.constant dense<0.000000e+00> : vector<8x256xf32>
    %169 = tpu.matmul %167, %168, %cst_102 {dimension_numbers = #tpu.dot_dimension_numbers<[1], [0], [0], [1], [0, 0, 1, 1], [], []>} : vector<8x144xbf16>, vector<144x256xbf16>, vector<8x256xf32> -> vector<8x256xf32>
    %170 = vector.broadcast %7 : vector<8x1xf32> to vector<8x256xf32>
    %171 = arith.addf %169, %170 : vector<8x256xf32>
    %cst_103 = arith.constant dense<0.000000e+00> : vector<8xf32>
    %172 = vector.multi_reduction <add>, %171, %cst_103 [1] : vector<8x256xf32> to vector<8xf32>
    %173 = vector.shape_cast %172 : vector<8xf32> to vector<8x1xf32>
    %174 = arith.mulf %171, %171 : vector<8x256xf32>
    %cst_104 = arith.constant dense<0.000000e+00> : vector<8xf32>
    %175 = vector.multi_reduction <add>, %174, %cst_104 [1] : vector<8x256xf32> to vector<8xf32>
    %176 = vector.shape_cast %175 : vector<8xf32> to vector<8x1xf32>
    %177 = tpu.iota {dimensions = array<i32: 0>} : vector<8x1xi32>
    %cst_105 = arith.constant 0.000000e+00 : f32
    %178 = vector.broadcast %cst_105 : f32 to vector<8x1xf32>
    %cst_106 = arith.constant 0.000000e+00 : f32
    %179 = vector.broadcast %cst_106 : f32 to vector<8x1xf32>
    %c0_i32_107 = arith.constant 0 : i32
    %180 = vector.broadcast %c0_i32_107 : i32 to vector<8x1xi32>
    %181 = arith.cmpi sge, %177, %180 : vector<8x1xi32>
    %c4_i32_108 = arith.constant 4 : i32
    %182 = vector.broadcast %c4_i32_108 : i32 to vector<8x1xi32>
    %183 = arith.cmpi slt, %177, %182 : vector<8x1xi32>
    %184 = arith.andi %181, %183 : vector<8x1xi1>
    %185 = arith.extui %184 : vector<8x1xi1> to vector<8x1xi32>
    %186 = arith.sitofp %185 : vector<8x1xi32> to vector<8x1xf32>
    %187 = arith.mulf %186, %173 : vector<8x1xf32>
    %cst_109 = arith.constant dense<0.000000e+00> : vector<1xf32>
    %188 = vector.multi_reduction <add>, %187, %cst_109 [0] : vector<8x1xf32> to vector<1xf32>
    %189 = vector.shape_cast %188 : vector<1xf32> to vector<1x1xf32>
    %cst_110 = arith.constant 9.765625E-4 : f32
    %190 = vector.broadcast %cst_110 : f32 to vector<1x1xf32>
    %191 = arith.mulf %189, %190 : vector<1x1xf32>
    %192 = vector.broadcast %191 : vector<1x1xf32> to vector<8x1xf32>
    %193 = arith.mulf %186, %192 : vector<8x1xf32>
    %194 = arith.addf %178, %193 : vector<8x1xf32>
    %195 = arith.mulf %186, %176 : vector<8x1xf32>
    %cst_111 = arith.constant dense<0.000000e+00> : vector<1xf32>
    %196 = vector.multi_reduction <add>, %195, %cst_111 [0] : vector<8x1xf32> to vector<1xf32>
    %197 = vector.shape_cast %196 : vector<1xf32> to vector<1x1xf32>
    %cst_112 = arith.constant 9.765625E-4 : f32
    %198 = vector.broadcast %cst_112 : f32 to vector<1x1xf32>
    %199 = arith.mulf %197, %198 : vector<1x1xf32>
    %200 = vector.broadcast %199 : vector<1x1xf32> to vector<8x1xf32>
    %201 = arith.mulf %186, %200 : vector<8x1xf32>
    %202 = arith.addf %179, %201 : vector<8x1xf32>
    %c4_i32_113 = arith.constant 4 : i32
    %203 = vector.broadcast %c4_i32_113 : i32 to vector<8x1xi32>
    %204 = arith.cmpi sge, %177, %203 : vector<8x1xi32>
    %c8_i32 = arith.constant 8 : i32
    %205 = vector.broadcast %c8_i32 : i32 to vector<8x1xi32>
    %206 = arith.cmpi slt, %177, %205 : vector<8x1xi32>
    %207 = arith.andi %204, %206 : vector<8x1xi1>
    %208 = arith.extui %207 : vector<8x1xi1> to vector<8x1xi32>
    %209 = arith.sitofp %208 : vector<8x1xi32> to vector<8x1xf32>
    %210 = arith.mulf %209, %173 : vector<8x1xf32>
    %cst_114 = arith.constant dense<0.000000e+00> : vector<1xf32>
    %211 = vector.multi_reduction <add>, %210, %cst_114 [0] : vector<8x1xf32> to vector<1xf32>
    %212 = vector.shape_cast %211 : vector<1xf32> to vector<1x1xf32>
    %cst_115 = arith.constant 9.765625E-4 : f32
    %213 = vector.broadcast %cst_115 : f32 to vector<1x1xf32>
    %214 = arith.mulf %212, %213 : vector<1x1xf32>
    %215 = vector.broadcast %214 : vector<1x1xf32> to vector<8x1xf32>
    %216 = arith.mulf %209, %215 : vector<8x1xf32>
    %217 = arith.addf %194, %216 : vector<8x1xf32>
    %218 = arith.mulf %209, %176 : vector<8x1xf32>
    %cst_116 = arith.constant dense<0.000000e+00> : vector<1xf32>
    %219 = vector.multi_reduction <add>, %218, %cst_116 [0] : vector<8x1xf32> to vector<1xf32>
    %220 = vector.shape_cast %219 : vector<1xf32> to vector<1x1xf32>
    %cst_117 = arith.constant 9.765625E-4 : f32
    %221 = vector.broadcast %cst_117 : f32 to vector<1x1xf32>
    %222 = arith.mulf %220, %221 : vector<1x1xf32>
    %223 = vector.broadcast %222 : vector<1x1xf32> to vector<8x1xf32>
    %224 = arith.mulf %209, %223 : vector<8x1xf32>
    %225 = arith.addf %202, %224 : vector<8x1xf32>
    %226 = arith.mulf %217, %217 : vector<8x1xf32>
    %227 = arith.subf %225, %226 : vector<8x1xf32>
    %cst_118 = arith.constant 9.99999997E-7 : f32
    %228 = vector.broadcast %cst_118 : f32 to vector<8x1xf32>
    %229 = arith.addf %227, %228 : vector<8x1xf32>
    %230 = math.rsqrt %229 : vector<8x1xf32>
    %231 = arith.mulf %5, %230 : vector<8x1xf32>
    %232 = arith.mulf %217, %231 : vector<8x1xf32>
    %233 = arith.subf %6, %232 : vector<8x1xf32>
    %234 = vector.broadcast %231 : vector<8x1xf32> to vector<8x256xf32>
    %235 = arith.mulf %171, %234 : vector<8x256xf32>
    %236 = vector.broadcast %233 : vector<8x1xf32> to vector<8x256xf32>
    %237 = arith.addf %235, %236 : vector<8x256xf32>
    %cst_119 = arith.constant 0.000000e+00 : f32
    %238 = vector.broadcast %cst_119 : f32 to vector<8x256xf32>
    %239 = arith.cmpf oge, %237, %238 : vector<8x256xf32>
    %cst_120 = arith.constant 2.000000e-01 : f32
    %240 = vector.broadcast %cst_120 : f32 to vector<8x256xf32>
    %241 = arith.mulf %240, %237 : vector<8x256xf32>
    %242 = arith.select %239, %237, %241 : vector<8x256xi1>, vector<8x256xf32>
    %c0_121 = arith.constant 0 : index
    %c128_122 = arith.constant 128 : index
    %243 = vector.load %arg8[%c0_121, %c128_122] : memref<8x512xf32, #tpu.memory_space<vmem>>, vector<8x256xf32>
    tpu.vector_store %arg8[%c0_121, %c128_122], %242 {strides = array<i32>} : memref<8x512xf32, #tpu.memory_space<vmem>>, vector<8x256xf32>,
    %c0_123 = arith.constant 0 : index
    %c111_124 = arith.constant 111 : index
    %244 = vector.load %arg8[%c0_123, %c111_124] : memref<8x512xf32, #tpu.memory_space<vmem>>, vector<8x256xf32>
    %c0_125 = arith.constant 0 : index
    %c0_126 = arith.constant 0 : index
    %c0_127 = arith.constant 0 : index
    %245 = vector.load %arg2[%c0_125, %c0_126, %c0_127] : memref<9x1x256xf32, #tpu.memory_space<vmem>>, vector<1x1x256xf32>
    %246 = vector.shape_cast %245 : vector<1x1x256xf32> to vector<1x256xf32>
    %cst_128 = arith.constant 0.000000e+00 : f32
    %247 = vector.broadcast %cst_128 : f32 to vector<1x256xf32>
    %248 = arith.cmpf one, %246, %247 : vector<1x256xf32>
    %cst_129 = arith.constant 0.000000e+00 : f32
    %249 = vector.shape_cast %248 : vector<1x256xi1> to vector<1x256xi1>
    %250 = vector.broadcast %249 : vector<1x256xi1> to vector<8x256xi1>
    %251 = vector.broadcast %cst_129 : f32 to vector<8x256xf32>
    %252 = arith.select %250, %244, %251 : vector<8x256xi1>, vector<8x256xf32>
    %253 = arith.truncf %252 : vector<8x256xf32> to vector<8x256xbf16>
    %c0_130 = arith.constant 0 : index
    %c0_131 = arith.constant 0 : index
    %254 = vector.load %arg9[%c0_130, %c0_131] : memref<144x256xbf16, #tpu.memory_space<vmem>>, vector<8x256xbf16>
    tpu.vector_store %arg9[%c0_130, %c0_131], %253 {strides = array<i32>} : memref<144x256xbf16, #tpu.memory_space<vmem>>, vector<8x256xbf16>,
    %cst_132 = arith.constant 0.000000e+00 : bf16
    %255 = vector.broadcast %cst_132 : bf16 to vector<8x256xbf16>
    %c8_133 = arith.constant 8 : index
    %c0_134 = arith.constant 0 : index
    %256 = vector.load %arg9[%c8_133, %c0_134] : memref<144x256xbf16, #tpu.memory_space<vmem>>, vector<8x256xbf16>
    tpu.vector_store %arg9[%c8_133, %c0_134], %255 {strides = array<i32>} : memref<144x256xbf16, #tpu.memory_space<vmem>>, vector<8x256xbf16>,
    %c0_135 = arith.constant 0 : index
    %c112_136 = arith.constant 112 : index
    %257 = vector.load %arg8[%c0_135, %c112_136] : memref<8x512xf32, #tpu.memory_space<vmem>>, vector<8x256xf32>
    %c1_137 = arith.constant 1 : index
    %c0_138 = arith.constant 0 : index
    %c0_139 = arith.constant 0 : index
    %258 = vector.load %arg2[%c1_137, %c0_138, %c0_139] : memref<9x1x256xf32, #tpu.memory_space<vmem>>, vector<1x1x256xf32>
    %259 = vector.shape_cast %258 : vector<1x1x256xf32> to vector<1x256xf32>
    %cst_140 = arith.constant 0.000000e+00 : f32
    %260 = vector.broadcast %cst_140 : f32 to vector<1x256xf32>
    %261 = arith.cmpf one, %259, %260 : vector<1x256xf32>
    %cst_141 = arith.constant 0.000000e+00 : f32
    %262 = vector.shape_cast %261 : vector<1x256xi1> to vector<1x256xi1>
    %263 = vector.broadcast %262 : vector<1x256xi1> to vector<8x256xi1>
    %264 = vector.broadcast %cst_141 : f32 to vector<8x256xf32>
    %265 = arith.select %263, %257, %264 : vector<8x256xi1>, vector<8x256xf32>
    %266 = arith.truncf %265 : vector<8x256xf32> to vector<8x256xbf16>
    %c16_142 = arith.constant 16 : index
    %c0_143 = arith.constant 0 : index
    %267 = vector.load %arg9[%c16_142, %c0_143] : memref<144x256xbf16, #tpu.memory_space<vmem>>, vector<8x256xbf16>
    tpu.vector_store %arg9[%c16_142, %c0_143], %266 {strides = array<i32>} : memref<144x256xbf16, #tpu.memory_space<vmem>>, vector<8x256xbf16>,
    %cst_144 = arith.constant 0.000000e+00 : bf16
    %268 = vector.broadcast %cst_144 : bf16 to vector<8x256xbf16>
    %c24 = arith.constant 24 : index
    %c0_145 = arith.constant 0 : index
    %269 = vector.load %arg9[%c24, %c0_145] : memref<144x256xbf16, #tpu.memory_space<vmem>>, vector<8x256xbf16>
    tpu.vector_store %arg9[%c24, %c0_145], %268 {strides = array<i32>} : memref<144x256xbf16, #tpu.memory_space<vmem>>, vector<8x256xbf16>,
    %c0_146 = arith.constant 0 : index
    %c113_147 = arith.constant 113 : index
    %270 = vector.load %arg8[%c0_146, %c113_147] : memref<8x512xf32, #tpu.memory_space<vmem>>, vector<8x256xf32>
    %c2_148 = arith.constant 2 : index
    %c0_149 = arith.constant 0 : index
    %c0_150 = arith.constant 0 : index
    %271 = vector.load %arg2[%c2_148, %c0_149, %c0_150] : memref<9x1x256xf32, #tpu.memory_space<vmem>>, vector<1x1x256xf32>
    %272 = vector.shape_cast %271 : vector<1x1x256xf32> to vector<1x256xf32>
    %cst_151 = arith.constant 0.000000e+00 : f32
    %273 = vector.broadcast %cst_151 : f32 to vector<1x256xf32>
    %274 = arith.cmpf one, %272, %273 : vector<1x256xf32>
    %cst_152 = arith.constant 0.000000e+00 : f32
    %275 = vector.shape_cast %274 : vector<1x256xi1> to vector<1x256xi1>
    %276 = vector.broadcast %275 : vector<1x256xi1> to vector<8x256xi1>
    %277 = vector.broadcast %cst_152 : f32 to vector<8x256xf32>
    %278 = arith.select %276, %270, %277 : vector<8x256xi1>, vector<8x256xf32>
    %279 = arith.truncf %278 : vector<8x256xf32> to vector<8x256xbf16>
    %c32_153 = arith.constant 32 : index
    %c0_154 = arith.constant 0 : index
    %280 = vector.load %arg9[%c32_153, %c0_154] : memref<144x256xbf16, #tpu.memory_space<vmem>>, vector<8x256xbf16>
    tpu.vector_store %arg9[%c32_153, %c0_154], %279 {strides = array<i32>} : memref<144x256xbf16, #tpu.memory_space<vmem>>, vector<8x256xbf16>,
    %cst_155 = arith.constant 0.000000e+00 : bf16
    %281 = vector.broadcast %cst_155 : bf16 to vector<8x256xbf16>
    %c40 = arith.constant 40 : index
    %c0_156 = arith.constant 0 : index
    %282 = vector.load %arg9[%c40, %c0_156] : memref<144x256xbf16, #tpu.memory_space<vmem>>, vector<8x256xbf16>
    tpu.vector_store %arg9[%c40, %c0_156], %281 {strides = array<i32>} : memref<144x256xbf16, #tpu.memory_space<vmem>>, vector<8x256xbf16>,
    %c0_157 = arith.constant 0 : index
    %c127_158 = arith.constant 127 : index
    %283 = vector.load %arg8[%c0_157, %c127_158] : memref<8x512xf32, #tpu.memory_space<vmem>>, vector<8x256xf32>
    %c3_159 = arith.constant 3 : index
    %c0_160 = arith.constant 0 : index
    %c0_161 = arith.constant 0 : index
    %284 = vector.load %arg2[%c3_159, %c0_160, %c0_161] : memref<9x1x256xf32, #tpu.memory_space<vmem>>, vector<1x1x256xf32>
    %285 = vector.shape_cast %284 : vector<1x1x256xf32> to vector<1x256xf32>
    %cst_162 = arith.constant 0.000000e+00 : f32
    %286 = vector.broadcast %cst_162 : f32 to vector<1x256xf32>
    %287 = arith.cmpf one, %285, %286 : vector<1x256xf32>
    %cst_163 = arith.constant 0.000000e+00 : f32
    %288 = vector.shape_cast %287 : vector<1x256xi1> to vector<1x256xi1>
    %289 = vector.broadcast %288 : vector<1x256xi1> to vector<8x256xi1>
    %290 = vector.broadcast %cst_163 : f32 to vector<8x256xf32>
    %291 = arith.select %289, %283, %290 : vector<8x256xi1>, vector<8x256xf32>
    %292 = arith.truncf %291 : vector<8x256xf32> to vector<8x256xbf16>
    %c48_164 = arith.constant 48 : index
    %c0_165 = arith.constant 0 : index
    %293 = vector.load %arg9[%c48_164, %c0_165] : memref<144x256xbf16, #tpu.memory_space<vmem>>, vector<8x256xbf16>
    tpu.vector_store %arg9[%c48_164, %c0_165], %292 {strides = array<i32>} : memref<144x256xbf16, #tpu.memory_space<vmem>>, vector<8x256xbf16>,
    %cst_166 = arith.constant 0.000000e+00 : bf16
    %294 = vector.broadcast %cst_166 : bf16 to vector<8x256xbf16>
    %c56 = arith.constant 56 : index
    %c0_167 = arith.constant 0 : index
    %295 = vector.load %arg9[%c56, %c0_167] : memref<144x256xbf16, #tpu.memory_space<vmem>>, vector<8x256xbf16>
    tpu.vector_store %arg9[%c56, %c0_167], %294 {strides = array<i32>} : memref<144x256xbf16, #tpu.memory_space<vmem>>, vector<8x256xbf16>,
    %c0_168 = arith.constant 0 : index
    %c128_169 = arith.constant 128 : index
    %296 = vector.load %arg8[%c0_168, %c128_169] : memref<8x512xf32, #tpu.memory_space<vmem>>, vector<8x256xf32>
    %297 = arith.truncf %296 : vector<8x256xf32> to vector<8x256xbf16>
    %c64_170 = arith.constant 64 : index
    %c0_171 = arith.constant 0 : index
    %298 = vector.load %arg9[%c64_170, %c0_171] : memref<144x256xbf16, #tpu.memory_space<vmem>>, vector<8x256xbf16>
    tpu.vector_store %arg9[%c64_170, %c0_171], %297 {strides = array<i32>} : memref<144x256xbf16, #tpu.memory_space<vmem>>, vector<8x256xbf16>,
    %cst_172 = arith.constant 0.000000e+00 : bf16
    %299 = vector.broadcast %cst_172 : bf16 to vector<8x256xbf16>
    %c72 = arith.constant 72 : index
    %c0_173 = arith.constant 0 : index
    %300 = vector.load %arg9[%c72, %c0_173] : memref<144x256xbf16, #tpu.memory_space<vmem>>, vector<8x256xbf16>
    tpu.vector_store %arg9[%c72, %c0_173], %299 {strides = array<i32>} : memref<144x256xbf16, #tpu.memory_space<vmem>>, vector<8x256xbf16>,
    %c0_174 = arith.constant 0 : index
    %c129_175 = arith.constant 129 : index
    %301 = vector.load %arg8[%c0_174, %c129_175] : memref<8x512xf32, #tpu.memory_space<vmem>>, vector<8x256xf32>
    %c5_176 = arith.constant 5 : index
    %c0_177 = arith.constant 0 : index
    %c0_178 = arith.constant 0 : index
    %302 = vector.load %arg2[%c5_176, %c0_177, %c0_178] : memref<9x1x256xf32, #tpu.memory_space<vmem>>, vector<1x1x256xf32>
    %303 = vector.shape_cast %302 : vector<1x1x256xf32> to vector<1x256xf32>
    %cst_179 = arith.constant 0.000000e+00 : f32
    %304 = vector.broadcast %cst_179 : f32 to vector<1x256xf32>
    %305 = arith.cmpf one, %303, %304 : vector<1x256xf32>
    %cst_180 = arith.constant 0.000000e+00 : f32
    %306 = vector.shape_cast %305 : vector<1x256xi1> to vector<1x256xi1>
    %307 = vector.broadcast %306 : vector<1x256xi1> to vector<8x256xi1>
    %308 = vector.broadcast %cst_180 : f32 to vector<8x256xf32>
    %309 = arith.select %307, %301, %308 : vector<8x256xi1>, vector<8x256xf32>
    %310 = arith.truncf %309 : vector<8x256xf32> to vector<8x256xbf16>
    %c80_181 = arith.constant 80 : index
    %c0_182 = arith.constant 0 : index
    %311 = vector.load %arg9[%c80_181, %c0_182] : memref<144x256xbf16, #tpu.memory_space<vmem>>, vector<8x256xbf16>
    tpu.vector_store %arg9[%c80_181, %c0_182], %310 {strides = array<i32>} : memref<144x256xbf16, #tpu.memory_space<vmem>>, vector<8x256xbf16>,
    %cst_183 = arith.constant 0.000000e+00 : bf16
    %312 = vector.broadcast %cst_183 : bf16 to vector<8x256xbf16>
    %c88 = arith.constant 88 : index
    %c0_184 = arith.constant 0 : index
    %313 = vector.load %arg9[%c88, %c0_184] : memref<144x256xbf16, #tpu.memory_space<vmem>>, vector<8x256xbf16>
    tpu.vector_store %arg9[%c88, %c0_184], %312 {strides = array<i32>} : memref<144x256xbf16, #tpu.memory_space<vmem>>, vector<8x256xbf16>,
    %c0_185 = arith.constant 0 : index
    %c143_186 = arith.constant 143 : index
    %314 = vector.load %arg8[%c0_185, %c143_186] : memref<8x512xf32, #tpu.memory_space<vmem>>, vector<8x256xf32>
    %c6_187 = arith.constant 6 : index
    %c0_188 = arith.constant 0 : index
    %c0_189 = arith.constant 0 : index
    %315 = vector.load %arg2[%c6_187, %c0_188, %c0_189] : memref<9x1x256xf32, #tpu.memory_space<vmem>>, vector<1x1x256xf32>
    %316 = vector.shape_cast %315 : vector<1x1x256xf32> to vector<1x256xf32>
    %cst_190 = arith.constant 0.000000e+00 : f32
    %317 = vector.broadcast %cst_190 : f32 to vector<1x256xf32>
    %318 = arith.cmpf one, %316, %317 : vector<1x256xf32>
    %cst_191 = arith.constant 0.000000e+00 : f32
    %319 = vector.shape_cast %318 : vector<1x256xi1> to vector<1x256xi1>
    %320 = vector.broadcast %319 : vector<1x256xi1> to vector<8x256xi1>
    %321 = vector.broadcast %cst_191 : f32 to vector<8x256xf32>
    %322 = arith.select %320, %314, %321 : vector<8x256xi1>, vector<8x256xf32>
    %323 = arith.truncf %322 : vector<8x256xf32> to vector<8x256xbf16>
    %c96_192 = arith.constant 96 : index
    %c0_193 = arith.constant 0 : index
    %324 = vector.load %arg9[%c96_192, %c0_193] : memref<144x256xbf16, #tpu.memory_space<vmem>>, vector<8x256xbf16>
    tpu.vector_store %arg9[%c96_192, %c0_193], %323 {strides = array<i32>} : memref<144x256xbf16, #tpu.memory_space<vmem>>, vector<8x256xbf16>,
    %cst_194 = arith.constant 0.000000e+00 : bf16
    %325 = vector.broadcast %cst_194 : bf16 to vector<8x256xbf16>
    %c104 = arith.constant 104 : index
    %c0_195 = arith.constant 0 : index
    %326 = vector.load %arg9[%c104, %c0_195] : memref<144x256xbf16, #tpu.memory_space<vmem>>, vector<8x256xbf16>
    tpu.vector_store %arg9[%c104, %c0_195], %325 {strides = array<i32>} : memref<144x256xbf16, #tpu.memory_space<vmem>>, vector<8x256xbf16>,
    %c0_196 = arith.constant 0 : index
    %c144_197 = arith.constant 144 : index
    %327 = vector.load %arg8[%c0_196, %c144_197] : memref<8x512xf32, #tpu.memory_space<vmem>>, vector<8x256xf32>
    %c7_198 = arith.constant 7 : index
    %c0_199 = arith.constant 0 : index
    %c0_200 = arith.constant 0 : index
    %328 = vector.load %arg2[%c7_198, %c0_199, %c0_200] : memref<9x1x256xf32, #tpu.memory_space<vmem>>, vector<1x1x256xf32>
    %329 = vector.shape_cast %328 : vector<1x1x256xf32> to vector<1x256xf32>
    %cst_201 = arith.constant 0.000000e+00 : f32
    %330 = vector.broadcast %cst_201 : f32 to vector<1x256xf32>
    %331 = arith.cmpf one, %329, %330 : vector<1x256xf32>
    %cst_202 = arith.constant 0.000000e+00 : f32
    %332 = vector.shape_cast %331 : vector<1x256xi1> to vector<1x256xi1>
    %333 = vector.broadcast %332 : vector<1x256xi1> to vector<8x256xi1>
    %334 = vector.broadcast %cst_202 : f32 to vector<8x256xf32>
    %335 = arith.select %333, %327, %334 : vector<8x256xi1>, vector<8x256xf32>
    %336 = arith.truncf %335 : vector<8x256xf32> to vector<8x256xbf16>
    %c112_203 = arith.constant 112 : index
    %c0_204 = arith.constant 0 : index
    %337 = vector.load %arg9[%c112_203, %c0_204] : memref<144x256xbf16, #tpu.memory_space<vmem>>, vector<8x256xbf16>
    tpu.vector_store %arg9[%c112_203, %c0_204], %336 {strides = array<i32>} : memref<144x256xbf16, #tpu.memory_space<vmem>>, vector<8x256xbf16>,
    %cst_205 = arith.constant 0.000000e+00 : bf16
    %338 = vector.broadcast %cst_205 : bf16 to vector<8x256xbf16>
    %c120 = arith.constant 120 : index
    %c0_206 = arith.constant 0 : index
    %339 = vector.load %arg9[%c120, %c0_206] : memref<144x256xbf16, #tpu.memory_space<vmem>>, vector<8x256xbf16>
    tpu.vector_store %arg9[%c120, %c0_206], %338 {strides = array<i32>} : memref<144x256xbf16, #tpu.memory_space<vmem>>, vector<8x256xbf16>,
    %c0_207 = arith.constant 0 : index
    %c145_208 = arith.constant 145 : index
    %340 = vector.load %arg8[%c0_207, %c145_208] : memref<8x512xf32, #tpu.memory_space<vmem>>, vector<8x256xf32>
    %c8_209 = arith.constant 8 : index
    %c0_210 = arith.constant 0 : index
    %c0_211 = arith.constant 0 : index
    %341 = vector.load %arg2[%c8_209, %c0_210, %c0_211] : memref<9x1x256xf32, #tpu.memory_space<vmem>>, vector<1x1x256xf32>
    %342 = vector.shape_cast %341 : vector<1x1x256xf32> to vector<1x256xf32>
    %cst_212 = arith.constant 0.000000e+00 : f32
    %343 = vector.broadcast %cst_212 : f32 to vector<1x256xf32>
    %344 = arith.cmpf one, %342, %343 : vector<1x256xf32>
    %cst_213 = arith.constant 0.000000e+00 : f32
    %345 = vector.shape_cast %344 : vector<1x256xi1> to vector<1x256xi1>
    %346 = vector.broadcast %345 : vector<1x256xi1> to vector<8x256xi1>
    %347 = vector.broadcast %cst_213 : f32 to vector<8x256xf32>
    %348 = arith.select %346, %340, %347 : vector<8x256xi1>, vector<8x256xf32>
    %349 = arith.truncf %348 : vector<8x256xf32> to vector<8x256xbf16>
    %c128_214 = arith.constant 128 : index
    %c0_215 = arith.constant 0 : index
    %350 = vector.load %arg9[%c128_214, %c0_215] : memref<144x256xbf16, #tpu.memory_space<vmem>>, vector<8x256xbf16>
    tpu.vector_store %arg9[%c128_214, %c0_215], %349 {strides = array<i32>} : memref<144x256xbf16, #tpu.memory_space<vmem>>, vector<8x256xbf16>,
    %cst_216 = arith.constant 0.000000e+00 : bf16
    %351 = vector.broadcast %cst_216 : bf16 to vector<8x256xbf16>
    %c136 = arith.constant 136 : index
    %c0_217 = arith.constant 0 : index
    %352 = vector.load %arg9[%c136, %c0_217] : memref<144x256xbf16, #tpu.memory_space<vmem>>, vector<8x256xbf16>
    tpu.vector_store %arg9[%c136, %c0_217], %351 {strides = array<i32>} : memref<144x256xbf16, #tpu.memory_space<vmem>>, vector<8x256xbf16>,
    %c0_218 = arith.constant 0 : index
    %c0_219 = arith.constant 0 : index
    %353 = vector.load %arg5[%c0_218, %c0_219] : memref<8x144xbf16, #tpu.memory_space<vmem>>, vector<8x144xbf16>
    %c0_220 = arith.constant 0 : index
    %c0_221 = arith.constant 0 : index
    %354 = vector.load %arg9[%c0_220, %c0_221] : memref<144x256xbf16, #tpu.memory_space<vmem>>, vector<144x256xbf16>
    %cst_222 = arith.constant dense<0.000000e+00> : vector<8x256xf32>
    %355 = tpu.matmul %353, %354, %cst_222 {dimension_numbers = #tpu.dot_dimension_numbers<[1], [0], [0], [1], [0, 0, 1, 1], [], []>} : vector<8x144xbf16>, vector<144x256xbf16>, vector<8x256xf32> -> vector<8x256xf32>
    %356 = vector.broadcast %8 : vector<8x1xf32> to vector<8x256xf32>
    %357 = arith.addf %355, %356 : vector<8x256xf32>
    %c0_223 = arith.constant 0 : index
    %c0_224 = arith.constant 0 : index
    %358 = vector.load %arg6[%c0_223, %c0_224] : memref<8x4xbf16, #tpu.memory_space<vmem>>, vector<8x4xbf16>
    %cst_225 = arith.constant dense<0.000000e+00> : vector<8x256xf32>
    %359 = tpu.matmul %358, %2, %cst_225 {dimension_numbers = #tpu.dot_dimension_numbers<[1], [0], [0], [1], [0, 0, 1, 1], [], []>} : vector<8x4xbf16>, vector<4x256xbf16>, vector<8x256xf32> -> vector<8x256xf32>
    %360 = arith.addf %357, %359 : vector<8x256xf32>
    %cst_226 = arith.constant 0.707106769 : f32
    %361 = vector.broadcast %cst_226 : f32 to vector<8x256xf32>
    %362 = arith.mulf %360, %361 : vector<8x256xf32>
    %c0_227 = arith.constant 0 : index
    %c0_228 = arith.constant 0 : index
    %c0_229 = arith.constant 0 : index
    %363 = vector.load %arg7[%c0_227, %c0_228, %c0_229] : memref<1x8x256xf32, #tpu.memory_space<vmem>>, vector<1x8x256xf32>
    %364 = vector.shape_cast %363 : vector<1x8x256xf32> to vector<8x256xf32>
    %365 = vector.shape_cast %362 : vector<8x256xf32> to vector<1x8x256xf32>
    tpu.vector_store %arg7[%c0_227, %c0_228, %c0_229], %365 {strides = array<i32>} : memref<1x8x256xf32, #tpu.memory_space<vmem>>, vector<1x8x256xf32>,
    return
  }
  func.func @transform_0(%arg0: i32) -> (i32, i32, i32) {
    %c0_i32 = arith.constant 0 : i32
    %c0_i32_0 = arith.constant 0 : i32
    %c0_i32_1 = arith.constant 0 : i32
    return %arg0, %c0_i32, %c0_i32_0 : i32, i32, i32
  }
  func.func @transform_1(%arg0: i32) -> (i32, i32, i32) {
    %c0_i32 = arith.constant 0 : i32
    %c0_i32_0 = arith.constant 0 : i32
    %c0_i32_1 = arith.constant 0 : i32
    %c0_i32_2 = arith.constant 0 : i32
    return %c0_i32, %c0_i32_0, %c0_i32_1 : i32, i32, i32
  }
  func.func @transform_2(%arg0: i32) -> (i32, i32) {
    %c0_i32 = arith.constant 0 : i32
    %c0_i32_0 = arith.constant 0 : i32
    %c0_i32_1 = arith.constant 0 : i32
    return %c0_i32, %c0_i32_0 : i32, i32
  }
  func.func @transform_3(%arg0: i32) -> (i32, i32) {
    %c0_i32 = arith.constant 0 : i32
    %c0_i32_0 = arith.constant 0 : i32
    %c0_i32_1 = arith.constant 0 : i32
    return %c0_i32, %c0_i32_0 : i32, i32
  }
  func.func @transform_4(%arg0: i32) -> (i32, i32) {
    %c0_i32 = arith.constant 0 : i32
    %c0_i32_0 = arith.constant 0 : i32
    %c0_i32_1 = arith.constant 0 : i32
    return %c0_i32, %c0_i32_0 : i32, i32
  }
  func.func @transform_5(%arg0: i32) -> (i32, i32) {
    %c0_i32 = arith.constant 0 : i32
    %c0_i32_0 = arith.constant 0 : i32
    %c0_i32_1 = arith.constant 0 : i32
    return %c0_i32, %c0_i32_0 : i32, i32
  }
  func.func @transform_6(%arg0: i32) -> (i32, i32, i32) {
    %c0_i32 = arith.constant 0 : i32
    %c0_i32_0 = arith.constant 0 : i32
    %c0_i32_1 = arith.constant 0 : i32
    return %arg0, %c0_i32, %c0_i32_0 : i32, i32, i32
  }
}

</mosaic_0001>

<bundles_post_ra>
// kernel: _lambda_.1
= control target key start
LH: loop header
LB: loop body
LE: loop exit
PB: predicated region body
PF: predicated region fallthrough
CT: control target
= control target key end

     0   :  { %s1869_s21 = smov 0   ;;  %s2368_s0 = inlined_call_operand.vmem [shape: f32[2,4,256], index: 0, kind: input, shape index: {}]   ;;  %s2369_s1 = inlined_call_operand.vmem [shape: f32[9,1,256], index: 1, kind: input, shape index: {}]   ;;  %s2370_s2 = inlined_call_operand.vmem [shape: f32[8,8], index: 2, kind: input, shape index: {}]   ;;  %s2371_s3 = inlined_call_operand.vmem [shape: bf16[8,144], index: 3, kind: input, shape index: {}]   ;;  %s2372_s4 = inlined_call_operand.vmem [shape: bf16[8,144], index: 4, kind: input, shape index: {}]   ;;  %s2373_s5 = inlined_call_operand.vmem [shape: bf16[8,4], index: 5, kind: input, shape index: {}]   ;;  %s2374_s6 = inlined_call_operand.vmem [shape: f32[2,8,256], index: 6, kind: output, shape index: {}]  }
   0x1 LB: > { %s1581_s22 = sadd.s32 4294967295, %s1816_s21   ;;  %p1585_p0 = scmp.ge.s32.totalorder %s1816_s21, 1  ;;  %s1816_s21 = sphi %s1869_s21, %s16_s21  }
   0x2   : > { %p212_p1 = scmp.lt.s32.totalorder %s1816_s21, 3 }
   0x4   : > { %p213_p2 = pnand %p1585_p0, %p212_p1 }
   0x5   : > { %p242_p3 = scmp.lt.s32.totalorder (!%p213_p2), %s1581_s22, 1  ;;  %s1821_s29 = smov (!%p213_p2), 1  }
   0x6   : > { %216 = sbr.rel (%p213_p2) target bundleno = 1622 (0x656), region = 44  ;;  %s1822_s30 = smov (!%p213_p2), 112  }
   0x7   : > { %s1823_s7 = smov (!%p213_p2), 113   ;;  %s1824_s8 = smov (!%p213_p2), 127  }
   0x8   : > { %s1826_s9 = smov (!%p213_p2), 16   ;;  %s1827_s10 = smov (!%p213_p2), 17  }
   0x9   : > { %s1828_s11 = smov (!%p213_p2), 111   ;;  %s1829_s12 = smov (!%p213_p2), 15  }
   0xb   : > { %s2430_s22 = smov (!%p242_p3, %s1581_s22), 1  ;;  %vm261_vm0 = vcmask 1043456   ;;  %v1818_v10 = vmov 0   ;;  %v276_v11 = vlaneseq  ;;  %v1819_v13 = vmov 0.0   ;;  %v259_v41 = vld [vmem:[%s2370_s2] sm:$0xf] }
   0xc   : > { %s1670_s23 = sshll.u32 %s2430_s22, 3  ;;  %1714 = vset.pattern.permute.xlu1 %v1818_v10  ;;  %391 = vst [vmem:[#allocation3] sm:$0xcc] %v1818_v10  ;;  %435 = vst [vmem:[#allocation3 + $0x78] sm:$0xcc] %v1818_v10  ;;  %v1820_v40 = vmov 1  }
   0xd   : > { %s246_s26 = scalar_lea.vmem %s2368_s0, %s1670_s23  ;;  %479 = vst [vmem:[#allocation3 + $0x20] sm:$0xcc] %v1818_v10  ;;  %523 = vst [vmem:[#allocation3 + $0x70] sm:$0xcc] %v1818_v10  ;;  %v1908_v12 = vshrl.u32 %v276_v11, 7  ;;  %1715 = vset.pattern.permute.xlu0 %v1820_v40  ;;  %vm419_vm3 = vcmask 130048  }
   0xe   : > { %v1883_v0 = vld [vmem:[%s246_s26] sm:$0xff]  ;;  %536 = vst [vmem:[#allocation3 + $0x88] sm:$0xcc] %v1818_v10  ;;  %580 = vst [vmem:[#allocation3 + $0x50] sm:$0xcc] %v1818_v10  ;;  %v1830_v40 = vmov 4  }
   0xf   : > { %v1887_v1 = vcombine.high %v1883_v0, %v1883_v0  ;;  %v262_v2 = vsel %vm261_vm0, %v1883_v0, 0.0  ;;  %v267_v3 = vmul.f32 %v1883_v0, %v1883_v0  ;;  %624 = vst [vmem:[#allocation3 + $0x10] sm:$0xcc] %v1818_v10  ;;  %668 = vst [vmem:[#allocation3 + $0x30] sm:$0xcc] %v1818_v10  ;;  %vm279_vm1 = vcmp.lt.s32.totalorder %v1908_v12, 4 }
  0x10   : > { %712 = vst [vmem:[#allocation3 + $0x68] sm:$0xcc] %v1818_v10  ;;  %1262 = vst [vmem:[#allocation3 + $0x18] sm:$0xff] %v1818_v10  ;;  %v1912_v14 = vsel %vm279_vm1, 1.0, %v1819_v13  ;;  %v628_v47 = vld [vmem:[#allocation2 + $0x10] sm:$0xf] }
  0x11   : > { %v263_v4 = vsel %vm261_vm0, %v1887_v1, 0.0  ;;  %v269_v5 = vcombine.high %v267_v3, %v267_v3  ;;  %v271_v6 = vsel %vm261_vm0, %v267_v3, 0.0  ;;  %v584_v48 = vld [vmem:[#allocation2 + $0x10] sm:$0xf]  ;;  %v1825_v50 = vmov 839922192  }
  0x12   : > { %v264_v7 = vadd.f32 %v263_v4, %v262_v2  ;;  %v540_v49 = vld [vmem:[#allocation2 + $0x10] sm:$0xf]  ;;  %v321_v51 = vunpack.c.l.s4 %v1825_v50  ;;  %v481_v63 = vld [vmem:[#allocation2 + $0x18] sm:$0xf]  ;;  %vm652_vm9 = vcmask 916480   ;;  %vm608_vm11 = vcmask 924672  }
  0x13   : > { %v272_v8 = vsel %vm261_vm0, %v269_v5, 0.0  ;;  %s1671_s17 = sshll.u32 %s2430_s22, 4 }
  0x14   : > { %265 = vadd.xlane.f32.xlu0 %v264_v7  ;;  %v273_v9 = vadd.f32 %v272_v8, %v271_v6  ;;  %v322_v52 = vunpack.c.0.s8 %v321_v51 }
  0x16   : > { %v325_v53 = vsub.s32 %v322_v52, %v1908_v12  ;;  %v1596_v52 = vld [vmem:[%s2369_s1 + $0x6] sm:$0x3] }
  0x17   : > { %vm486_vm7 = vcmp.ne.f32.partialorder %v1596_v52, 0.0 }
  0x18   : > { %274 = vadd.xlane.f32.xlu0 %v273_v9 }
  0x9d   : > { %v266_v15 = vpop.xlane.xlu0 %265 }
  0x9e   : > { %v283_v16 = vmul.f32 %v1912_v14, %v266_v15 }
  0xa0   : > { %v284_v17 = vsel %vm261_vm0, %v283_v16, 0.0  ;;  %v672_v16 = vld [vmem:[#allocation2 + $0x10] sm:$0xf] }
  0xa1   : > { %v285_v18 = vrot.slane %v284_v17, 4  ;;  %v275_v19 = vpop.xlane.xlu0 %274 }
  0xa2   : > { %v294_v20 = vmul.f32 %v1912_v14, %v275_v19 }
  0xa3   : > { %v286_v21 = vadd.f32 %v285_v18, %v284_v17 }
  0xa4   : > { %v295_v22 = vsel %vm261_vm0, %v294_v20, 0.0  ;;  %vm564_vm0 = vcmask 1039360  }
  0xa5   : > { %v287_v23 = vrot.slane %v286_v21, 2  ;;  %v296_v24 = vrot.slane %v295_v22, 4 }
  0xa7   : > { %v288_v25 = vadd.f32 %v287_v23, %v286_v21  ;;  %v297_v26 = vadd.f32 %v296_v24, %v295_v22  ;;  %v437_v23 = vld [vmem:[#allocation2 + $0x18] sm:$0xf] }
  0xa9   : > { %v289_v27 = vrot.slane %v288_v25, 1  ;;  %v298_v28 = vrot.slane %v297_v26, 2 }
  0xab   : > { %v299_v29 = vadd.f32 %v298_v28, %v297_v26  ;;  %v290_v30 = vadd.f32 %v289_v27, %v288_v25  ;;  %v393_v28 = vld [vmem:[#allocation2 + $0x18] sm:$0xf] }
  0xad   : > { %v300_v31 = vrot.slane %v299_v29, 1  ;;  %v291_v32 = vmul.f32 0.0009765625, %v290_v30 }
  0xaf   : > { %v301_v33 = vadd.f32 %v300_v31, %v299_v29  ;;  %v292_v34 = vmul.f32 %v1912_v14, %v291_v32  ;;  %v350_v31 = vld [vmem:[#allocation2 + $0x18] sm:$0xf] }
  0xb1   : > { %v302_v35 = vmul.f32 0.0009765625, %v301_v33  ;;  %v305_v37 = vmul.f32 %v292_v34, %v292_v34 }
  0xb3   : > { %v303_v36 = vmul.f32 %v1912_v14, %v302_v35 }
  0xb5   : > { %v306_v38 = vsub.f32 %v303_v36, %v305_v37  ;;  %v1945_v37 = vld [vmem:[%s2371_s3] sm:$0xff] }
  0xb7   : > { %v307_v39 = vadd.f32 1e-06, %v306_v38  ;;  %v1608_v38 = vcombine.high %v1945_v37, %v1945_v37 }
  0xb9   : > { %1805 = vrsqrt.f32 %v307_v39  ;;  %1627 = vmatprep.mubr.msk.bf16.mxu0 %vm419_vm3, %v1608_v38  ;;  %v1953_v39 = vld [vmem:[%s2370_s2] sm:$0xff] }
  0xc6   : > { %v1806_v42 = vpop.eup %1805 }
  0xc7   : > { %v309_v43 = vmul.f32 %v1806_v42, %v259_v41 }
  0xc9   : > { %v310_v44 = vmul.f32 %v309_v43, %v292_v34 }
  0xcb   : > { %312 = vrot.lane.b32.xlu1 %v310_v44, %s1821_s29 }
  0xcf   : > { %318 = vperm.xlu1 %1714, %v309_v43   ;;  %v1603_v43 = vld [vmem:[%s2369_s1 + $0xe] sm:$0x3] }
  0xd0   : > { %vm631_vm4 = vcmp.ne.f32.partialorder %v1603_v43, 0.0 }
  0xd3   : > { %650 = vrot.lane.b32.xlu1 %v628_v47, %s1822_s30  ;;  %v632_v47 = vsel %vm631_vm4, 1, %v1818_v10 }
  0xd4   : > { %1756 = vset.pattern.permute.xlu1 %v1830_v40 }
  0xd7   : > { %606 = vrot.lane.b32.xlu1 %v584_v48, %s1823_s7  ;;  %v1967_v48 = vsub.s32 0, %v1908_v12 }
  0xd9   : > { %v636_v51 = vrot.slane %v632_v47, %v1967_v48 }
  0xdb   : > { %562 = vrot.lane.b32.xlu1 %v540_v49, %s1824_s8  ;;  %v1599_v49 = vld [vmem:[%s2369_s1 + $0xa] sm:$0x3]  ;;  %vm1980_vm8 = vcmp.eq.s32.totalorder %v636_v51, 1 }
  0xdc   : > { %vm543_vm6 = vcmp.ne.f32.partialorder %v1599_v49, 0.0 }
 0x13d   : > { %v313_v45 = vpop.permute.xlu1 %312 }
 0x13e   : > { %v315_v46 = vsub.f32 %v259_v41, %v313_v45  ;;  %v1601_v45 = vld [vmem:[%s2369_s1 + $0xc] sm:$0x3] }
 0x13f   : > { %vm587_vm5 = vcmp.ne.f32.partialorder %v1601_v45, 0.0 }
 0x140   : > { %331 = vperm.xlu0 %1715, %v315_v46   ;;  %v1963_v46 = vsub.s32 1, %v1908_v12 }
 0x14a   : > { %v319_v54 = vpop.permute.xlu1 %318 }
 0x14b   : > { %v326_v55 = vrot.slane %v319_v54, %v325_v53  ;;  %v588_v54 = vsel %vm587_vm5, 1, %v1818_v10 }
 0x14d   : > { %v328_v57 = vmul.f32 %v326_v55, %v1883_v0 }
 0x14e   : > { %v651_v41 = vpop.permute.xlu1 %650 }
 0x152   : > { %v607_v42 = vpop.permute.xlu1 %606 }
 0x156   : > { %v563_v44 = vpop.permute.xlu1 %562 }
 0x1bb   : > { %v332_v56 = vpop.permute.xlu0 %331 }
 0x1bc   : > { %v339_v58 = vrot.slane %v332_v56, %v325_v53  ;;  %v640_v53 = vrot.slane %v632_v47, %v1963_v46  ;;  %v353_v47 = vld [vmem:[%s2369_s1] sm:$0x3] }
 0x1be   : > { %v341_v59 = vadd.f32 %v339_v58, %v328_v57  ;;  %v592_v57 = vrot.slane %v588_v54, %v1967_v48  ;;  %v544_v58 = vsel %vm543_vm6, 1, %v1818_v10  ;;  %vm642_vm10 = vcmp.eq.s32.totalorder %v640_v53, 1 }
 0x1c0   : > { %vm342_vm2 = vcmp.ge.f32.partialorder %v341_v59, 0.0  ;;  %v343_v60 = vmul.f32 0.2, %v341_v59  ;;  %vm1993_vm12 = vcmp.eq.s32.totalorder %v592_v57, 1 }
 0x1c2   : > { %v344_v61 = vsel %vm342_vm2, %v341_v59, %v343_v60  ;;  %vm507_vm2 = vcmask 7168  }
 0x1c3   : > { %v346_v62 = vcombine.high %v344_v61, %v344_v61  ;;  %348 = vst [vmem:[#allocation2] sm:$0xf] %v344_v61  ;;  %v596_v61 = vrot.slane %v588_v54, %v1963_v46 }
 0x1c5   : > { %349 = vst [vmem:[#allocation2 + $0x8] sm:$0xf] %v346_v62  ;;  %v487_v62 = vsel %vm486_vm7, 1, %v1818_v10  ;;  %vm598_vm13 = vcmp.eq.s32.totalorder %v596_v61, 1  ;;  %vm463_vm7 = vcmask 121856  }
 0x1c6   : > { %v1605_v61 = vld [vmem:[%s2369_s1 + $0x10] sm:$0x3] }
 0x1ca   : > { %v482_v2 = vld [vmem:[#allocation2] sm:$0xf] }
 0x1cb   : > { %v1716_v3 = vpack.i.bf16 %v482_v2, %v481_v63  ;;  %v626_v6 = vld [vmem:[#allocation2] sm:$0xf] }
 0x1cc   : > { %v395_v4 = vld [vmem:[#allocation2 + $0x8] sm:$0xf]  ;;  %v582_v15 = vld [vmem:[#allocation2] sm:$0xf] }
 0x1cd   : > { %v627_v5 = vld [vmem:[#allocation2 + $0x8] sm:$0xf]  ;;  %1717 = vrot.lane.b32.xlu1 %v1716_v3, %s1821_s29  ;;  %417 = vrot.lane.b32.xlu0 %v395_v4, %s1826_s9  ;;  %v525_v17 = vld [vmem:[#allocation2] sm:$0xf]  ;;  %v548_v3 = vrot.slane %v544_v58, %v1967_v48 }
 0x1ce   : > { %v1721_v7 = vpack.i.bf16 %v627_v5, %v626_v6  ;;  %v352_v8 = vld [vmem:[#allocation2 + $0x8] sm:$0xf]  ;;  %v538_v21 = vld [vmem:[#allocation2] sm:$0xf] }
 0x1cf   : > { %v583_v9 = vld [vmem:[#allocation2 + $0x8] sm:$0xf]  ;;  %v438_v24 = vld [vmem:[#allocation2] sm:$0xf]  ;;  %vm2006_vm15 = vcmp.eq.s32.totalorder %v548_v3, 1 }
 0x1d0   : > { %v526_v11 = vld [vmem:[#allocation2 + $0x8] sm:$0xf]  ;;  %v1726_v18 = vpack.i.bf16 %v583_v9, %v582_v15  ;;  %v1736_v25 = vpack.i.bf16 %v438_v24, %v437_v23  ;;  %v394_v29 = vld [vmem:[#allocation2] sm:$0xf]  ;;  %v1594_v9 = vld [vmem:[%s2369_s1 + $0x4] sm:$0x3] }
 0x1d1   : > { %1722 = vrot.lane.b32.xlu1 %v1721_v7, %s1822_s30  ;;  %373 = vrot.lane.b32.xlu0 %v352_v8, %s1827_s10  ;;  %v1676_v19 = vpack.c.bf16 %v526_v11, %v525_v17  ;;  %v539_v20 = vld [vmem:[#allocation2 + $0x8] sm:$0xf]  ;;  %v1741_v30 = vpack.i.bf16 %v394_v29, %v393_v28  ;;  %v351_v32 = vld [vmem:[#allocation2] sm:$0xf]  ;;  %v552_v8 = vrot.slane %v544_v58, %v1963_v46  ;;  %vm442_vm14 = vcmp.ne.f32.partialorder %v1594_v9, 0.0 }
 0x1d2   : > { %v1731_v22 = vpack.i.bf16 %v539_v20, %v538_v21  ;;  %v483_v26 = vld [vmem:[#allocation2 + $0x8] sm:$0xf]  ;;  %v1746_v33 = vpack.i.bf16 %v351_v32, %v350_v31  ;;  %v670_v35 = vld [vmem:[#allocation2] sm:$0xf]  ;;  %v495_v29 = vrot.slane %v487_v62, %v1963_v46 }
 0x1d3   : > { %535 = vst [vmem:[#allocation3 + $0x88] sm:$0x33] %v1676_v19  ;;  %v439_v27 = vld [vmem:[#allocation2 + $0x8] sm:$0xf]  ;;  %v491_v19 = vrot.slane %v487_v62, %v1967_v48  ;;  %vm554_vm1 = vcmp.eq.s32.totalorder %v552_v8, 1 }
 0x1d4   : > { %v671_v34 = vld [vmem:[#allocation2 + $0x8] sm:$0xf]  ;;  %vm2027_vm5 = vcmp.eq.s32.totalorder %v495_v29, 1 }
 0x1d5   : > { %1727 = vrot.lane.b32.xlu1 %v1726_v18, %s1823_s7  ;;  %694 = vrot.lane.b32.xlu0 %v672_v16, %s1828_s11  ;;  %v1751_v36 = vpack.i.bf16 %v671_v34, %v670_v35  ;;  %vm2023_vm4 = vcmp.eq.s32.totalorder %v491_v19, 1 }
 0x1d9   : > { %1732 = vrot.lane.b32.xlu1 %v1731_v22, %s1824_s8 }
 0x1da   : > { %v723_v9 = vld [vmem:[#allocation3 + $0x88] sm:$0xff] }
 0x1dd   : > { %1737 = vrot.lane.b32.xlu1 %v1736_v25, %s1829_s12 }
 0x1e1   : > { %505 = vrot.lane.b32.xlu1 %v483_v26, %s1821_s29 }
 0x1e5   : > { %461 = vrot.lane.b32.xlu1 %v439_v27, %s1829_s12 }
 0x1e9   : > { %1742 = vrot.lane.b32.xlu1 %v1741_v30, %s1826_s9  ;;  %v443_v30 = vsel %vm442_vm14, 1, %v1818_v10 }
 0x1ea   : > { %v447_v40 = vrot.slane %v443_v30, %v1967_v48 }
 0x1ed   : > { %1747 = vrot.lane.b32.xlu1 %v1746_v33, %s1827_s10  ;;  %v1592_v33 = vld [vmem:[%s2369_s1 + $0x2] sm:$0x3] }
 0x1ee   : > { %vm398_vm6 = vcmp.ne.f32.partialorder %v1592_v33, 0.0 }
 0x1f1   : > { %1752 = vrot.lane.b32.xlu1 %v1751_v36, %s1828_s11 }
 0x1f5   : > { %735 = vperm.xlu1 %1756, %v1953_v39  }
 0x23f   : > { %v1972_v50 = vpop.permute.xlu1 %1717 }
 0x240   : > { %v1720_v27 = vunpack.i.h.bf16 %v1972_v50  ;;  %v1719_v28 = vunpack.i.l.bf16 %v1972_v50 }
 0x243   : > { %v1723_v56 = vpop.permute.xlu1 %1722 }
 0x244   : > { %v1725_v59 = vunpack.i.h.bf16 %v1723_v56  ;;  %v1724_v60 = vunpack.i.l.bf16 %v1723_v56 }
 0x246   : > { %v654_v63 = vsel %vm652_vm9, %v1725_v59, %v651_v41  ;;  %v653_v2 = vsel %vm652_vm9, %v1724_v60, %v1725_v59  ;;  %v451_v41 = vrot.slane %v443_v30, %v1963_v46  ;;  %v399_v60 = vsel %vm398_vm6, 1, %v1818_v10 }
 0x247   : > { %v658_v4 = vsel %vm642_vm10, %v654_v63, 0.0  ;;  %v657_v5 = vsel %vm1980_vm8, %v653_v2, 0.0  ;;  %v1728_v7 = vpop.permute.xlu1 %1727  ;;  %vm2038_vm8 = vcmp.eq.s32.totalorder %v447_v40, 1  ;;  %v407_v8 = vrot.slane %v399_v60, %v1963_v46 }
 0x248   : > { %v1679_v11 = vpack.c.bf16 %v658_v4, %v657_v5  ;;  %v1730_v15 = vunpack.i.h.bf16 %v1728_v7  ;;  %v1729_v16 = vunpack.i.l.bf16 %v1728_v7  ;;  %vm2042_vm10 = vcmp.eq.s32.totalorder %v451_v41, 1 }
 0x249   : > { %v403_v7 = vrot.slane %v399_v60, %v1967_v48  ;;  %v1617_v30 = vcombine.low %v723_v9, %v1818_v10 }
 0x24a   : > { %667 = vst [vmem:[#allocation3 + $0x30] sm:$0x33] %v1679_v11  ;;  %v610_v17 = vsel %vm608_vm11, %v1730_v15, %v607_v42  ;;  %v609_v18 = vsel %vm608_vm11, %v1729_v16, %v1730_v15  ;;  %v418_v11 = vpop.permute.xlu0 %417 }
 0x24b   : > { %v614_v20 = vsel %vm598_vm13, %v610_v17, 0.0  ;;  %v613_v21 = vsel %vm1993_vm12, %v609_v18, 0.0  ;;  %v1733_v23 = vpop.permute.xlu1 %1732  ;;  %vm354_vm12 = vcmp.ne.f32.partialorder %v353_v47, 0.0  ;;  %vm675_vm13 = vcmp.ne.f32.partialorder %v1605_v61, 0.0 }
 0x24c   : > { %v1678_v24 = vpack.c.bf16 %v614_v20, %v613_v21  ;;  %v1735_v25 = vunpack.i.h.bf16 %v1733_v23  ;;  %v1734_v26 = vunpack.i.l.bf16 %v1733_v23  ;;  %v355_v5 = vsel %vm354_vm12, 1, %v1818_v10 }
 0x24d   : > { %v359_v21 = vrot.slane %v355_v5, %v1967_v48  ;;  %v1618_v23 = vcombine.high %v723_v9, %v1818_v10  ;;  %vm2072_vm14 = vcmp.eq.s32.totalorder %v403_v7, 1  ;;  %vm906_vm12 = vcmp.ge.s32.totalorder %v1908_v12, 4 }
 0x24e   : > { %623 = vst [vmem:[#allocation3 + $0x10] sm:$0x33] %v1678_v24  ;;  %v566_v31 = vsel %vm564_vm0, %v1735_v25, %v563_v44  ;;  %v565_v32 = vsel %vm564_vm0, %v1734_v26, %v1735_v25  ;;  %v508_v44 = vsel %vm507_vm2, %v1719_v28, %v1720_v27  ;;  %v363_v24 = vrot.slane %v355_v5, %v1963_v46 }
 0x24f   : > { %v570_v34 = vsel %vm554_vm1, %v566_v31, 0.0  ;;  %v569_v35 = vsel %vm2006_vm15, %v565_v32, 0.0  ;;  %v1738_v36 = vpop.permute.xlu1 %1737  ;;  %v512_v57 = vsel %vm2023_vm4, %v508_v44, 0.0  ;;  %v676_v25 = vsel %vm675_vm13, 1, %v1818_v10 }
 0x250   : > { %v1677_v38 = vpack.c.bf16 %v570_v34, %v569_v35  ;;  %v1740_v49 = vunpack.i.h.bf16 %v1738_v36  ;;  %v1739_v50 = vunpack.i.l.bf16 %v1738_v36  ;;  %vm2076_vm15 = vcmp.eq.s32.totalorder %v407_v8, 1  ;;  %v374_v35 = vpop.permute.xlu0 %373 }
 0x251   : > { %v729_v45 = vld [vmem:[#allocation3 + $0x30] sm:$0xff]  ;;  %vm375_vm1 = vcmask 138240   ;;  %vm2083_vm4 = vcmp.eq.s32.totalorder %v359_v21, 1  ;;  %v680_v34 = vrot.slane %v676_v25, %v1967_v48  ;;  %v684_v43 = vrot.slane %v676_v25, %v1963_v46 }
 0x252   : > { %579 = vst [vmem:[#allocation3 + $0x50] sm:$0x33] %v1677_v38  ;;  %v1624_v51 = vcombine.high %v729_v45, %v1818_v10  ;;  %v1623_v52 = vcombine.low %v729_v45, %v1818_v10  ;;  %v464_v63 = vsel %vm463_vm7, %v1739_v50, %v1740_v49  ;;  %v1607_v21 = vcombine.low %v1945_v37, %v1945_v37 }
 0x253   : > { %v506_v53 = vpop.permute.xlu1 %505  ;;  %v468_v15 = vsel %vm2038_vm8, %v464_v63, 0.0  ;;  %vm2100_vm6 = vcmp.eq.s32.totalorder %v680_v34, 1  ;;  %vm696_vm8 = vcmask 908288   ;;  %v1628_v33 = vsel %vm906_vm12, 1.0, %v1819_v13 }
 0x254   : > { %v509_v54 = vsel %vm507_vm2, %v1720_v27, %v506_v53  ;;  %837 = vmatprep.subr.bf16.mxu0 %v1624_v51 }
 0x255   : > { %v513_v58 = vsel %vm2027_vm5, %v509_v54, 0.0  ;;  %838 = vmatpush1.bf16.msra.mxu0 %v1623_v52  ;;  %v727_v59 = vld [vmem:[#allocation3 + $0x10] sm:$0xff]  ;;  %vm2092_vm5 = vcmp.eq.s32.totalorder %v363_v24, 1 }
 0x256   : > { %v1675_v62 = vpack.c.bf16 %v513_v58, %v512_v57  ;;  %v1622_v2 = vcombine.high %v727_v59, %v1818_v10  ;;  %v1621_v3 = vcombine.low %v727_v59, %v1818_v10  ;;  %v695_v57 = vpop.permute.xlu0 %694 }
 0x257   : > { %v462_v4 = vpop.permute.xlu1 %461 }
 0x258   : > { %522 = vst [vmem:[#allocation3 + $0x70] sm:$0x33] %v1675_v62  ;;  %v465_v6 = vsel %vm463_vm7, %v1740_v49, %v462_v4  ;;  %839 = vmatprep.subr.bf16.mxu0 %v1622_v2 }
 0x259   : > { %v469_v16 = vsel %vm2042_vm10, %v465_v6, 0.0  ;;  %840 = vmatpush1.bf16.msra.mxu0 %v1621_v3  ;;  %v725_v17 = vld [vmem:[#allocation3 + $0x50] sm:$0xff]  ;;  %vm2108_vm10 = vcmp.eq.s32.totalorder %v684_v43, 1 }
 0x25a   : > { %v1674_v18 = vpack.c.bf16 %v469_v16, %v468_v15  ;;  %v1620_v19 = vcombine.high %v725_v17, %v1818_v10  ;;  %v1619_v20 = vcombine.low %v725_v17, %v1818_v10 }
 0x25b   : > { %v1743_v22 = vpop.permute.xlu1 %1742 }
 0x25c   : > { %478 = vst [vmem:[#allocation3 + $0x20] sm:$0x33] %v1674_v18  ;;  %v1745_v28 = vunpack.i.h.bf16 %v1743_v22  ;;  %v1744_v29 = vunpack.i.l.bf16 %v1743_v22  ;;  %841 = vmatprep.subr.bf16.mxu0 %v1620_v19 }
 0x25d   : > { %842 = vmatpush1.bf16.msra.mxu0 %v1619_v20 }
 0x25e   : > { %v421_v31 = vsel %vm419_vm3, %v1745_v28, %v418_v11  ;;  %v420_v32 = vsel %vm419_vm3, %v1744_v29, %v1745_v28  ;;  %843 = vmatprep.subr.bf16.mxu0 %v1618_v23 }
 0x25f   : > { %v425_v36 = vsel %vm2076_vm15, %v421_v31, 0.0  ;;  %v424_v38 = vsel %vm2072_vm14, %v420_v32, 0.0  ;;  %v1748_v41 = vpop.permute.xlu1 %1747  ;;  %v721_v42 = vld [vmem:[#allocation3 + $0x70] sm:$0xff]  ;;  %v1831_v32 = vmov 2   ;;  %vm1472_vm15 = vcmask 1041408  }
 0x260   : > { %v1673_v44 = vpack.c.bf16 %v425_v36, %v424_v38  ;;  %v1750_v45 = vunpack.i.h.bf16 %v1748_v41  ;;  %v1749_v47 = vunpack.i.l.bf16 %v1748_v41  ;;  %v1616_v49 = vcombine.high %v721_v42, %v1818_v10  ;;  %1757 = vset.pattern.permute.xlu1 %v1831_v32 }
 0x261   : > { %844 = vmatpush1.bf16.msra.mxu0 %v1617_v30  ;;  %v1615_v58 = vcombine.low %v721_v42, %v1818_v10 }
 0x262   : > { %434 = vst [vmem:[#allocation3 + $0x78] sm:$0x33] %v1673_v44  ;;  %v377_v50 = vsel %vm375_vm1, %v1750_v45, %v374_v35  ;;  %v376_v51 = vsel %vm375_vm1, %v1749_v47, %v1750_v45  ;;  %845 = vmatprep.subr.bf16.mxu0 %v1616_v49 }
 0x263   : > { %v381_v53 = vsel %vm2092_vm5, %v377_v50, 0.0  ;;  %v380_v54 = vsel %vm2083_vm4, %v376_v51, 0.0  ;;  %v1753_v55 = vpop.permute.xlu1 %1752  ;;  %v719_v59 = vld [vmem:[#allocation3 + $0x20] sm:$0xff]  ;;  %vm1468_vm4 = vcmask 31744  }
 0x264   : > { %v1672_v60 = vpack.c.bf16 %v381_v53, %v380_v54  ;;  %v1755_v61 = vunpack.i.h.bf16 %v1753_v55  ;;  %v1754_v62 = vunpack.i.l.bf16 %v1753_v55  ;;  %v1614_v63 = vcombine.high %v719_v59, %v1818_v10 }
 0x265   : > { %846 = vmatpush1.bf16.msra.mxu0 %v1615_v58  ;;  %v1613_v6 = vcombine.low %v719_v59, %v1818_v10 }
 0x266   : > { %390 = vst [vmem:[#allocation3] sm:$0x33] %v1672_v60  ;;  %v697_v2 = vsel %vm696_vm8, %v1754_v62, %v1755_v61  ;;  %v698_v3 = vsel %vm696_vm8, %v1755_v61, %v695_v57  ;;  %847 = vmatprep.subr.bf16.mxu0 %v1614_v63 }
 0x267   : > { %v701_v4 = vsel %vm2100_vm6, %v697_v2, 0.0  ;;  %v702_v5 = vsel %vm2108_vm10, %v698_v3, 0.0 }
 0x268   : > { %v1680_v7 = vpack.c.bf16 %v702_v5, %v701_v4 }
 0x269   : > { %848 = vmatpush1.bf16.msra.mxu0 %v1613_v6  ;;  %v717_v8 = vld [vmem:[#allocation3 + $0x78] sm:$0xff] }
 0x26a   : > { %711 = vst [vmem:[#allocation3 + $0x68] sm:$0x33] %v1680_v7  ;;  %v1612_v9 = vcombine.high %v717_v8, %v1818_v10  ;;  %v1611_v11 = vcombine.low %v717_v8, %v1818_v10 }
 0x26c   : > { %849 = vmatprep.subr.bf16.mxu0 %v1612_v9 }
 0x26d   : > { %850 = vmatpush1.bf16.msra.mxu0 %v1611_v11  ;;  %v715_v15 = vld [vmem:[#allocation3] sm:$0xff] }
 0x26e   : > { %v1610_v16 = vcombine.high %v715_v15, %v1818_v10  ;;  %v1609_v17 = vcombine.low %v715_v15, %v1818_v10 }
 0x270   : > { %851 = vmatprep.subr.bf16.mxu0 %v1610_v16  ;;  %v736_v22 = vpop.permute.xlu1 %735 }
 0x271   : > { %852 = vmatpush1.bf16.msra.mxu0 %v1609_v17  ;;  %v731_v18 = vld [vmem:[#allocation3 + $0x68] sm:$0xff] }
 0x272   : > { %v1626_v19 = vcombine.high %v731_v18, %v1818_v10  ;;  %v1625_v20 = vcombine.low %v731_v18, %v1818_v10 }
 0x274   : > { %867 = vmatprep.subr.bf16.mxu0 %v1626_v19 }
 0x275   : > { %868 = vmatpush2.bf16.msra.mxu0 %v1625_v20 }
 0x278   : > { %870 = vmatmul.mubr.bf16.vlgmr.msra.gmra.mxu0 %v1607_v21  ;;  %v1832_v21 = vmov 3  }
 0x279   : > { %1511 = vmatprep.mubr.bf16.mxu0 %v1818_v10  ;;  %1758 = vset.pattern.permute.xlu0 %v1832_v21 }
 0x338   : > { %v871_v23 = vpop.f32.mrf.mxu0 }
 0x339   : > { %v2130_v24 = vadd.f32 %v871_v23, %v736_v22 }
 0x33a   : > { %v873_v25 = vpop.f32.mrf.mxu0 }
 0x33b   : > { %v2132_v26 = vadd.f32 %v873_v25, %v736_v22  ;;  %v881_v29 = vmul.f32 %v2130_v24, %v2130_v24 }
 0x33c   : > { %v875_v27 = vpop.f32.mrf.mxu0 }
 0x33d   : > { %v878_v28 = vadd.f32 %v2132_v26, %v2130_v24  ;;  %v882_v37 = vmul.f32 %v2132_v26, %v2132_v26 }
 0x33e   : > { %v876_v30 = vpop.f32.mrf.mxu0 }
 0x33f   : > { %879 = vadd.xlane.f32.xlu0 %v878_v28  ;;  %v883_v31 = vadd.f32 %v882_v37, %v881_v29 }
 0x341   : > { %884 = vadd.xlane.f32.xlu1 %v883_v31 }
 0x3c8   : > { %v880_v34 = vpop.xlane.xlu0 %879 }
 0x3c9   : > { %v886_v35 = vmul.f32 %v1912_v14, %v880_v34  ;;  %v911_v36 = vmul.f32 %v1628_v33, %v880_v34 }
 0x3ca   : > { %v885_v38 = vpop.xlane.xlu1 %884 }
 0x3cb   : > { %v887_v40 = vrot.slane %v886_v35, 4  ;;  %v912_v41 = vrot.slane %v911_v36, 4  ;;  %v896_v42 = vmul.f32 %v1912_v14, %v885_v38  ;;  %v921_v43 = vmul.f32 %v1628_v33, %v885_v38 }
 0x3cd   : > { %v888_v44 = vadd.f32 %v887_v40, %v886_v35  ;;  %v913_v45 = vadd.f32 %v912_v41, %v911_v36  ;;  %v897_v47 = vrot.slane %v896_v42, 4  ;;  %v922_v49 = vrot.slane %v921_v43, 4 }
 0x3cf   : > { %v889_v50 = vrot.slane %v888_v44, 2  ;;  %v914_v51 = vrot.slane %v913_v45, 2  ;;  %v898_v52 = vadd.f32 %v897_v47, %v896_v42  ;;  %v923_v12 = vadd.f32 %v922_v49, %v921_v43  ;;  %v1641_v49 = vld [vmem:[%s2369_s1 + $0xe] sm:$0x3] }
 0x3d0   : > { %v258_v42 = vpack.c.bf16 %v1887_v1, %v1887_v1  ;;  %v257_v43 = vpack.c.bf16 %v1883_v0, %v1883_v0  ;;  %v2180_v1 = vld [vmem:[%s2372_s4] sm:$0xff]  ;;  %v1833_v0 = vmov 5   ;;  %vm1226_vm5 = vcmp.ne.f32.partialorder %v1641_v49, 0.0 }
 0x3d1   : > { %v890_v53 = vadd.f32 %v889_v50, %v888_v44  ;;  %v915_v13 = vadd.f32 %v914_v51, %v913_v45  ;;  %v899_v54 = vrot.slane %v898_v52, 2  ;;  %v924_v55 = vrot.slane %v923_v12, 2  ;;  %v1467_v45 = vld [vmem:[%s2373_s5] sm:$0xf]  ;;  %v1639_v50 = vld [vmem:[%s2369_s1 + $0xc] sm:$0x3] }
 0x3d2   : > { %1666 = vmatprep.subr.msk.bf16.mxu0 %vm1472_vm15, %v258_v42  ;;  %v1474_v44 = vsel %vm1472_vm15, %v257_v43, 0  ;;  %v1646_v47 = vcombine.high %v2180_v1, %v2180_v1  ;;  %v1637_v51 = vld [vmem:[%s2369_s1 + $0xa] sm:$0x3]  ;;  %vm1185_vm6 = vcmp.ne.f32.partialorder %v1639_v50, 0.0 }
 0x3d3   : > { %v891_v56 = vrot.slane %v890_v53, 1  ;;  %v916_v57 = vrot.slane %v915_v13, 1  ;;  %v900_v58 = vadd.f32 %v899_v54, %v898_v52  ;;  %v925_v59 = vadd.f32 %v924_v55, %v923_v12  ;;  %1494 = vmatpush1.bf16.msra.mxu0 %v1474_v44  ;;  %v1634_v55 = vld [vmem:[%s2369_s1 + $0x6] sm:$0x3]  ;;  %v2259_v44 = vld [vmem:[#allocation3 + $0x18] sm:$0xff] }
 0x3d4   : > { %1665 = vmatprep.mubr.msk.bf16.mxu1 %vm419_vm3, %v1646_v47  ;;  %v1227_v52 = vsel %vm1226_vm5, 1, %v1818_v10  ;;  %vm1144_vm10 = vcmp.ne.f32.partialorder %v1637_v51, 0.0  ;;  %v967_v47 = vld [vmem:[%s2369_s1] sm:$0x3] }
 0x3d5   : > { %v892_v60 = vadd.f32 %v891_v56, %v890_v53  ;;  %v917_v61 = vadd.f32 %v916_v57, %v915_v13  ;;  %v901_v62 = vrot.slane %v900_v58, 1  ;;  %v926_v63 = vrot.slane %v925_v59, 1  ;;  %v1632_v56 = vld [vmem:[%s2369_s1 + $0x4] sm:$0x3] }
 0x3d6   : > { %1667 = vmatmul.mubr.msk.bf16.vlgmr.msra.gmra.mxu0 %vm1468_vm4, %v1467_v45  ;;  %v1186_v53 = vsel %vm1185_vm6, 1, %v1818_v10  ;;  %v1145_v13 = vsel %vm1144_vm10, 1, %v1818_v10  ;;  %v1235_v54 = vrot.slane %v1227_v52, %v1963_v46  ;;  %vm1050_vm15 = vcmp.ne.f32.partialorder %v1632_v56, 0.0 }
 0x3d7   : > { %v893_v2 = vmul.f32 0.0009765625, %v892_v60  ;;  %v918_v3 = vmul.f32 0.0009765625, %v917_v61  ;;  %v902_v4 = vadd.f32 %v901_v62, %v900_v58  ;;  %v927_v5 = vadd.f32 %v926_v63, %v925_v59 }
 0x3d8   : > { %v1190_v57 = vrot.slane %v1186_v53, %v1967_v48  ;;  %v1194_v58 = vrot.slane %v1186_v53, %v1963_v46  ;;  %v1149_v59 = vrot.slane %v1145_v13, %v1967_v48 }
 0x3d9   : > { %v894_v6 = vmul.f32 %v1912_v14, %v893_v2  ;;  %v919_v7 = vmul.f32 %v1628_v33, %v918_v3  ;;  %v903_v8 = vmul.f32 0.0009765625, %v902_v4  ;;  %v928_v9 = vmul.f32 0.0009765625, %v927_v5 }
 0x3da   : > { %v1153_v2 = vrot.slane %v1145_v13, %v1963_v46  ;;  %vm2218_vm4 = vcmp.eq.s32.totalorder %v1190_v57, 1  ;;  %vm2222_vm5 = vcmp.eq.s32.totalorder %v1194_v58, 1  ;;  %vm2226_vm6 = vcmp.eq.s32.totalorder %v1149_v59, 1 }
 0x3db   : > { %v920_v11 = vadd.f32 %v919_v7, %v894_v6  ;;  %v904_v15 = vmul.f32 %v1912_v14, %v903_v8  ;;  %v929_v16 = vmul.f32 %v1628_v33, %v928_v9  ;;  %v1224_v14 = vld [vmem:[#allocation2 + $0x10] sm:$0xff] }
 0x3dc   : > { %vm2238_vm10 = vcmp.eq.s32.totalorder %v1153_v2, 1  ;;  %v1643_v2 = vld [vmem:[%s2369_s1 + $0x10] sm:$0x3] }
 0x3dd   : > { %v931_v17 = vmul.f32 %v920_v11, %v920_v11  ;;  %v930_v18 = vadd.f32 %v929_v16, %v904_v15 }
 0x3df   : > { %v932_v19 = vsub.f32 %v930_v18, %v931_v17 }
 0x3e1   : > { %v933_v20 = vadd.f32 1e-06, %v932_v19 }
 0x3e3   : > { %1807 = vrsqrt.f32 %v933_v20 }
 0x3f0   : > { %v1808_v22 = vpop.eup %1807 }
 0x3f1   : > { %v935_v23 = vmul.f32 %v1808_v22, %v1953_v39 }
 0x3f3   : > { %944 = vperm.xlu1 %1757, %v935_v23   ;;  %v936_v25 = vmul.f32 %v935_v23, %v920_v11  ;;  %v1051_v23 = vsel %vm1050_vm15, 1, %v1818_v10 }
 0x3f4   : > { %v1059_v50 = vrot.slane %v1051_v23, %v1963_v46 }
 0x3f5   : > { %938 = vrot.lane.b32.xlu0 %v936_v25, %s1821_s29 }
 0x3f7   : > { %1245 = vrot.lane.b32.xlu1 %v1224_v14, %s1822_s30 }
 0x467   : > { %v939_v27 = vpop.permute.xlu0 %938 }
 0x468   : > { %v941_v28 = vsub.f32 %v1953_v39, %v939_v27 }
 0x46a   : > { %951 = vperm.xlu0 %1758, %v941_v28  }
 0x46e   : > { %v945_v29 = vpop.permute.xlu1 %944  ;;  %1799 = vset.pattern.permute.xlu0 %v1833_v0 }
 0x46f   : > { %v947_v37 = vmul.f32 %v945_v29, %v2130_v24  ;;  %v948_v30 = vmul.f32 %v945_v29, %v2132_v26  ;;  %v1087_v24 = vld [vmem:[#allocation2 + $0x18] sm:$0xff]  ;;  %v1630_v29 = vld [vmem:[%s2369_s1 + $0x2] sm:$0x3] }
 0x472   : > { %v1246_v12 = vpop.permute.xlu1 %1245 }
 0x4e5   : > { %v952_v31 = vpop.permute.xlu0 %951 }
 0x4e6   : > { %v954_v32 = vadd.f32 %v952_v31, %v947_v37  ;;  %v955_v33 = vadd.f32 %v952_v31, %v948_v30 }
 0x4e8   : > { %vm956_vm13 = vcmp.ge.f32.partialorder %v954_v32, 0.0  ;;  %vm957_vm14 = vcmp.ge.f32.partialorder %v955_v33, 0.0  ;;  %v958_v34 = vmul.f32 0.2, %v954_v32  ;;  %v959_v35 = vmul.f32 0.2, %v955_v33 }
 0x4ea   : > { %v960_v36 = vsel %vm956_vm13, %v954_v32, %v958_v34  ;;  %v961_v38 = vsel %vm957_vm14, %v955_v33, %v959_v35  ;;  %vm2213_vm13 = vcmp.eq.s32.totalorder %v1235_v54, 1  ;;  %vm1091_vm14 = vcmp.ne.f32.partialorder %v1634_v55, 0.0 }
 0x4eb   : > { %962 = vst [vmem:[#allocation2] sm:$0xff] %v960_v36  ;;  %963 = vst [vmem:[#allocation2 + $0x8] sm:$0xff] %v961_v38  ;;  %v1759_v40 = vpack.i.bf16 %v961_v38, %v960_v36  ;;  %v2152_v41 = vpack.c.bf16 %v961_v38, %v960_v36  ;;  %v1774_v26 = vpack.i.bf16 %v960_v36, %v1087_v24  ;;  %v1092_v17 = vsel %vm1091_vm14, 1, %v1818_v10 }
 0x4ec   : > { %v1096_v31 = vrot.slane %v1092_v17, %v1967_v48  ;;  %v1100_v32 = vrot.slane %v1092_v17, %v1963_v46  ;;  %v1055_v24 = vrot.slane %v1051_v23, %v1967_v48  ;;  %vm2292_vm14 = vcmp.eq.s32.totalorder %v1059_v50, 1 }
 0x4ed   : > { %1760 = vrot.lane.b32.xlu1 %v1759_v40, %s1822_s30  ;;  %1765 = vrot.lane.b32.xlu0 %v1759_v40, %s1823_s7  ;;  %1138 = vst [vmem:[#allocation3 + $0x88] sm:$0xff] %v2152_v41  ;;  %s251_s30 = scalar_lea.vmem %s2374_s6, %s1671_s17 }
 0x4f1   : > { %1204 = vrot.lane.b32.xlu1 %v1224_v14, %s1823_s7  ;;  %1770 = vrot.lane.b32.xlu0 %v1759_v40, %s1824_s8 }
 0x4f5   : > { %1163 = vrot.lane.b32.xlu1 %v1224_v14, %s1824_s8  ;;  %1775 = vrot.lane.b32.xlu0 %v1774_v26, %s1821_s29 }
 0x4f9   : > { %1110 = vrot.lane.b32.xlu1 %v961_v38, %s1821_s29  ;;  %1780 = vrot.lane.b32.xlu0 %v1774_v26, %s1829_s12 }
 0x4fd   : > { %1069 = vrot.lane.b32.xlu1 %v961_v38, %s1829_s12  ;;  %1785 = vrot.lane.b32.xlu0 %v1774_v26, %s1826_s9 }
 0x501   : > { %1028 = vrot.lane.b32.xlu1 %v961_v38, %s1826_s9  ;;  %1790 = vrot.lane.b32.xlu0 %v1774_v26, %s1827_s10 }
 0x505   : > { %987 = vrot.lane.b32.xlu1 %v961_v38, %s1827_s10  ;;  %1795 = vrot.lane.b32.xlu0 %v1759_v40, %s1828_s11 }
 0x509   : > { %1286 = vrot.lane.b32.xlu1 %v1224_v14, %s1828_s11  ;;  %1324 = vperm.xlu0 %1799, %v1953_v39   ;;  %v1231_v39 = vrot.slane %v1227_v52, %v1967_v48 }
 0x50b   : > { %vm2209_vm12 = vcmp.eq.s32.totalorder %v1231_v39, 1 }
 0x55f   : > { %v1761_v62 = vpop.permute.xlu1 %1760  ;;  %v1766_v63 = vpop.permute.xlu0 %1765 }
 0x560   : > { %v1763_v3 = vunpack.i.h.bf16 %v1761_v62  ;;  %v1762_v4 = vunpack.i.l.bf16 %v1761_v62  ;;  %v1768_v5 = vunpack.i.h.bf16 %v1766_v63  ;;  %v1767_v6 = vunpack.i.l.bf16 %v1766_v63  ;;  %v1513_v62 = vpop.f32.mrf.mxu0 }
 0x562   : > { %v1248_v11 = vsel %vm652_vm9, %v1763_v3, %v1246_v12  ;;  %v1247_v15 = vsel %vm652_vm9, %v1762_v4, %v1763_v3  ;;  %v1206_v16 = vsel %vm608_vm11, %v1767_v6, %v1768_v5  ;;  %vm1009_vm9 = vcmp.ne.f32.partialorder %v1630_v29, 0.0 }
 0x563   : > { %v1252_v18 = vsel %vm2213_vm13, %v1248_v11, 0.0  ;;  %v1251_v19 = vsel %vm2209_vm12, %v1247_v15, 0.0  ;;  %v1205_v20 = vpop.permute.xlu1 %1204  ;;  %v1771_v21 = vpop.permute.xlu0 %1770  ;;  %v1210_v37 = vsel %vm2218_vm4, %v1206_v16, 0.0  ;;  %v1010_v39 = vsel %vm1009_vm9, 1, %v2259_v44 }
 0x564   : > { %v1688_v25 = vpack.c.bf16 %v1252_v18, %v1251_v19  ;;  %v1207_v27 = vsel %vm608_vm11, %v1768_v5, %v1205_v20  ;;  %v1773_v28 = vunpack.i.h.bf16 %v1771_v21  ;;  %v1772_v14 = vunpack.i.l.bf16 %v1771_v21 }
 0x565   : > { %v1211_v30 = vsel %vm2222_vm5, %v1207_v27, 0.0  ;;  %vm2269_vm11 = vcmp.eq.s32.totalorder %v1096_v31, 1  ;;  %vm2281_vm12 = vcmp.eq.s32.totalorder %v1055_v24, 1  ;;  %vm968_vm13 = vcmp.ne.f32.partialorder %v967_v47, 0.0 }
 0x566   : > { %1261 = vst [vmem:[#allocation3 + $0x30] sm:$0xff] %v1688_v25  ;;  %v1687_v33 = vpack.c.bf16 %v1211_v30, %v1210_v37  ;;  %v1165_v34 = vsel %vm564_vm0, %v1772_v14, %v1773_v28  ;;  %v1662_v35 = vcombine.high %v1688_v25, %v1818_v10  ;;  %v1661_v36 = vcombine.low %v1688_v25, %v1818_v10 }
 0x567   : > { %v1164_v38 = vpop.permute.xlu1 %1163  ;;  %v1776_v40 = vpop.permute.xlu0 %1775  ;;  %v1169_v10 = vsel %vm2226_vm6, %v1165_v34, 0.0  ;;  %v1014_v63 = vrot.slane %v1010_v39, %v1967_v48  ;;  %v1018_v5 = vrot.slane %v1010_v39, %v1963_v46  ;;  %v969_v6 = vsel %vm968_vm13, 1, %v2259_v44 }
 0x568   : > { %1220 = vst [vmem:[#allocation3 + $0x10] sm:$0xff] %v1687_v33  ;;  %v1166_v26 = vsel %vm564_vm0, %v1773_v28, %v1164_v38  ;;  %v1778_v42 = vunpack.i.h.bf16 %v1776_v40  ;;  %v1777_v43 = vunpack.i.l.bf16 %v1776_v40  ;;  %1426 = vmatprep.subr.bf16.mxu1 %v1662_v35  ;;  %v1660_v45 = vcombine.high %v1687_v33, %v2259_v44 }
 0x569   : > { %v1170_v0 = vsel %vm2238_vm10, %v1166_v26, 0.0  ;;  %1427 = vmatpush1.bf16.msra.mxu1 %v1661_v36  ;;  %vm2274_vm0 = vcmp.eq.s32.totalorder %v1100_v32, 1  ;;  %v1659_v55 = vcombine.low %v1687_v33, %v2259_v44  ;;  %v1656_v11 = vcombine.high %v2152_v41, %v2259_v44 }
 0x56a   : > { %v1686_v51 = vpack.c.bf16 %v1170_v0, %v1169_v10  ;;  %v1112_v12 = vsel %vm507_vm2, %v1777_v43, %v1778_v42  ;;  %1428 = vmatprep.subr.bf16.mxu1 %v1660_v45  ;;  %v973_v20 = vrot.slane %v969_v6, %v1967_v48  ;;  %v977_v21 = vrot.slane %v969_v6, %v1963_v46 }
 0x56b   : > { %v1111_v53 = vpop.permute.xlu1 %1110  ;;  %v1781_v13 = vpop.permute.xlu0 %1780  ;;  %v1116_v60 = vsel %vm2269_vm11, %v1112_v12, 0.0  ;;  %vm2314_vm15 = vcmp.eq.s32.totalorder %v1014_v63, 1  ;;  %v1655_v37 = vcombine.low %v2152_v41, %v2259_v44 }
 0x56c   : > { %1179 = vst [vmem:[#allocation3 + $0x50] sm:$0xff] %v1686_v51  ;;  %v1113_v56 = vsel %vm507_vm2, %v1778_v42, %v1111_v53  ;;  %v1783_v57 = vunpack.i.h.bf16 %v1781_v13  ;;  %v1782_v58 = vunpack.i.l.bf16 %v1781_v13  ;;  %v1658_v59 = vcombine.high %v1686_v51, %v2259_v44  ;;  %v1515_v63 = vpop.f32.mrf.mxu0 }
 0x56d   : > { %v1117_v61 = vsel %vm2274_vm0, %v1113_v56, 0.0  ;;  %1429 = vmatpush1.bf16.msra.mxu1 %v1659_v55  ;;  %v1657_v9 = vcombine.low %v1686_v51, %v2259_v44  ;;  %vm1267_vm2 = vcmp.ne.f32.partialorder %v1643_v2, 0.0  ;;  %vm2332_vm4 = vcmp.eq.s32.totalorder %v973_v20, 1 }
 0x56e   : > { %v1684_v3 = vpack.c.bf16 %v1117_v61, %v1116_v60  ;;  %v1071_v4 = vsel %vm463_vm7, %v1782_v58, %v1783_v57  ;;  %1430 = vmatprep.subr.bf16.mxu1 %v1658_v59  ;;  %v1268_v29 = vsel %vm1267_vm2, 1, %v2259_v44  ;;  %vm2336_vm5 = vcmp.eq.s32.totalorder %v977_v21, 1  ;;  %v1517_v2 = vpop.f32.mrf.mxu0 }
 0x56f   : > { %v1070_v7 = vpop.permute.xlu1 %1069  ;;  %v1786_v8 = vpop.permute.xlu0 %1785  ;;  %v1075_v18 = vsel %vm2281_vm12, %v1071_v4, 0.0  ;;  %v1272_v24 = vrot.slane %v1268_v29, %v1967_v48  ;;  %v1276_v26 = vrot.slane %v1268_v29, %v1963_v46  ;;  %v1645_v61 = vcombine.low %v2180_v1, %v2180_v1 }
 0x570   : > { %1126 = vst [vmem:[#allocation3 + $0x70] sm:$0xff] %v1684_v3  ;;  %v1072_v15 = vsel %vm463_vm7, %v1783_v57, %v1070_v7  ;;  %v1788_v16 = vunpack.i.h.bf16 %v1786_v8  ;;  %v1787_v17 = vunpack.i.l.bf16 %v1786_v8  ;;  %vm2318_vm7 = vcmp.eq.s32.totalorder %v1018_v5, 1 }
 0x571   : > { %v1076_v19 = vsel %vm2292_vm14, %v1072_v15, 0.0  ;;  %1431 = vmatpush1.bf16.msra.mxu1 %v1657_v9  ;;  %v1654_v33 = vcombine.high %v1684_v3, %v2259_v44  ;;  %v1653_v45 = vcombine.low %v1684_v3, %v2259_v44  ;;  %vm1278_vm6 = vcmp.eq.s32.totalorder %v1276_v26, 1  ;;  %v1518_v3 = vpop.f32.mrf.mxu0 }
 0x572   : > { %v1683_v22 = vpack.c.bf16 %v1076_v19, %v1075_v18  ;;  %v1030_v27 = vsel %vm419_vm3, %v1787_v17, %v1788_v16  ;;  %1432 = vmatprep.subr.bf16.mxu1 %v1656_v11 }
 0x573   : > { %v1029_v28 = vpop.permute.xlu1 %1028  ;;  %v1791_v14 = vpop.permute.xlu0 %1790  ;;  %v1034_v34 = vsel %vm2314_vm15, %v1030_v27, 0.0 }
 0x574   : > { %1085 = vst [vmem:[#allocation3 + $0x20] sm:$0xff] %v1683_v22  ;;  %v1031_v30 = vsel %vm419_vm3, %v1788_v16, %v1029_v28  ;;  %v1793_v31 = vunpack.i.h.bf16 %v1791_v14  ;;  %v1792_v32 = vunpack.i.l.bf16 %v1791_v14  ;;  %v1652_v49 = vcombine.high %v1683_v22, %v2259_v44 }
 0x575   : > { %v1035_v35 = vsel %vm2318_vm7, %v1031_v30, 0.0  ;;  %1433 = vmatpush1.bf16.msra.mxu1 %v1655_v37  ;;  %vm1277_vm3 = vcmp.eq.s32.totalorder %v1272_v24, 1  ;;  %v1651_v12 = vcombine.low %v1683_v22, %v2259_v44 }
 0x576   : > { %v1682_v41 = vpack.c.bf16 %v1035_v35, %v1034_v34  ;;  %v989_v40 = vsel %vm375_vm1, %v1792_v32, %v1793_v31  ;;  %1434 = vmatprep.subr.bf16.mxu1 %v1654_v33 }
 0x577   : > { %v988_v42 = vpop.permute.xlu1 %987  ;;  %v1796_v43 = vpop.permute.xlu0 %1795  ;;  %v993_v50 = vsel %vm2332_vm4, %v989_v40, 0.0 }
 0x578   : > { %1044 = vst [vmem:[#allocation3 + $0x78] sm:$0xff] %v1682_v41  ;;  %v990_v47 = vsel %vm375_vm1, %v1793_v31, %v988_v42  ;;  %v1798_v10 = vunpack.i.h.bf16 %v1796_v43  ;;  %v1797_v0 = vunpack.i.l.bf16 %v1796_v43  ;;  %v1650_v53 = vcombine.high %v1682_v41, %v2259_v44 }
 0x579   : > { %v994_v48 = vsel %vm2336_vm5, %v990_v47, 0.0  ;;  %1435 = vmatpush1.bf16.msra.mxu1 %v1653_v45  ;;  %v1649_v56 = vcombine.low %v1682_v41, %v2259_v44 }
 0x57a   : > { %v1681_v46 = vpack.c.bf16 %v994_v48, %v993_v50  ;;  %v1288_v51 = vsel %vm696_vm8, %v1797_v0, %v1798_v10  ;;  %1436 = vmatprep.subr.bf16.mxu1 %v1652_v49 }
 0x57b   : > { %v1287_v52 = vpop.permute.xlu1 %1286  ;;  %v1292_v13 = vsel %vm1277_vm3, %v1288_v51, 0.0 }
 0x57c   : > { %1003 = vst [vmem:[#allocation3] sm:$0xff] %v1681_v46  ;;  %v1289_v39 = vsel %vm696_vm8, %v1798_v10, %v1287_v52  ;;  %v1648_v57 = vcombine.high %v1681_v46, %v2259_v44  ;;  %v1647_v58 = vcombine.low %v1681_v46, %v2259_v44 }
 0x57d   : > { %v1293_v54 = vsel %vm1278_vm6, %v1289_v39, 0.0  ;;  %1437 = vmatpush1.bf16.msra.mxu1 %v1651_v12 }
 0x57e   : > { %v1689_v55 = vpack.c.bf16 %v1293_v54, %v1292_v13  ;;  %1438 = vmatprep.subr.bf16.mxu1 %v1650_v53 }
 0x580   : > { %1302 = vst [vmem:[#allocation3 + $0x68] sm:$0xff] %v1689_v55  ;;  %v1664_v59 = vcombine.high %v1689_v55, %v2259_v44  ;;  %v1663_v60 = vcombine.low %v1689_v55, %v2259_v44 }
 0x581   : > { %1439 = vmatpush1.bf16.msra.mxu1 %v1649_v56 }
 0x582   : > { %1440 = vmatprep.subr.bf16.mxu1 %v1648_v57 }
 0x584   : > { %v1325_v4 = vpop.permute.xlu0 %1324 }
 0x585   : > { %1441 = vmatpush1.bf16.msra.mxu1 %v1647_v58 }
 0x586   : > { %1456 = vmatprep.subr.bf16.mxu1 %v1664_v59 }
 0x589   : > { %1457 = vmatpush2.bf16.msra.mxu1 %v1663_v60 }
 0x58c   : > { %1459 = vmatmul.mubr.bf16.vlgmr.msra.gmra.mxu1 %v1645_v61 }
 0x64c   : > { %v1460_v5 = vpop.f32.mrf.mxu1 }
 0x64d   : > { %v1461_v6 = vadd.f32 %v1460_v5, %v1325_v4 }
 0x64e   : > { %v1462_v7 = vpop.f32.mrf.mxu1 }
 0x64f   : > { %v1520_v8 = vadd.f32 %v1513_v62, %v1461_v6  ;;  %v1463_v9 = vadd.f32 %v1462_v7, %v1325_v4 }
 0x650   : > { %v1464_v44 = vpop.f32.mrf.mxu1 }
 0x651   : > { %v1522_v11 = vmul.f32 0.70710677, %v1520_v8  ;;  %v1521_v1 = vadd.f32 %v1515_v63, %v1463_v9 }
 0x652   : > { %v1465_v15 = vpop.f32.mrf.mxu1 }
 0x653   : > { %1524 = vst [vmem:[%s251_s30] sm:$0xff] %v1522_v11  ;;  %v1523_v16 = vmul.f32 0.70710677, %v1521_v1 }
 0x655   : > { %1525 = vst [vmem:[%s251_s30 + $0x8] sm:$0xff] %v1523_v16 }
 0x656 PF: > { %s16_s21 = sadd.s32 1, %s1816_s21  }
 0x657   : > { %p13_p4 = scmp.ge.s32.totalorder %s16_s21, 4  }
 0x659   :  { %15 = sbr.rel (!%p13_p4) target bundleno = 1 (0x1), region = 81 }

</bundles_post_ra>
